<compile_context>
chip_gen: v7x
topology: tpu7x:2x2x1
jax: 0.10.0
libtpu: 0.0.40
codegen_flags: <defaults>
</compile_context>

<pallas_src>
import numpy as np
import jax
import jax.numpy as jnp
from jax.experimental import pallas as pl
from jax.experimental.pallas import tpu as pltpu


# ----------------------------- vocab + host glue -----------------------------

class Vocab:
    def __init__(self, chars):
        self.i2w = ["<pad>", "<unk>"] + list(chars)
        self.w2i = {c: i for i, c in enumerate(self.i2w)}
        self.pad = 0
        self.unk = 1

    def __len__(self):
        return len(self.i2w)


def prepare(sentence_batch, vocab):
    """Mirrors CharEmbeddings.prepare (host-side, numpy)."""
    sentence_lengths = [len(s) for s in sentence_batch]
    max_word_length = max(len(w) for s in sentence_batch for w in s)
    sentences = [[[int(vocab.w2i.get(c, vocab.unk)) for c in w] for w in s]
                 for s in sentence_batch]
    max_sent_len = max(sentence_lengths)
    padded_sentences = [s + (max_sent_len - len(s)) * [[]] for s in sentences]
    flat = [w for s in padded_sentences for w in s]
    word_lengths = np.array([len(w) for w in flat], dtype=np.int32)
    sort_idx = np.argsort(-word_lengths, kind="stable")        # descending
    sort_word_len = word_lengths[sort_idx]
    flat_sorted = [flat[i] for i in sort_idx]
    unsort_idx = np.argsort(sort_idx, kind="stable")
    padded_words = np.zeros((len(flat_sorted), max_word_length), dtype=np.int32)
    for i, w in enumerate(flat_sorted):
        if len(w) > 0:
            padded_words[i, : len(w)] = np.asarray(w, dtype=np.int32)
    return padded_words, sort_word_len, unsort_idx, max_sent_len


def remove_pad_words(padded_words, word_lengths):
    num_zeroes = int(np.sum(word_lengths == 0))
    nz = len(word_lengths) - num_zeroes
    return padded_words[:nz], word_lengths[:nz]


# ------------------------------- Pallas kernel --------------------------------

def _make_kernel(L, K, Vp):
    """Fused embedding-gather + conv1d (as one matmul) + mask + relu + maxpool.

    Masking invalid (pos >= length) positions to 0 *after* ReLU is mathematically
    identical to PyTorch's min(x)-fill for kept words (length >= 1, guaranteed by
    remove_pad_words): post-ReLU both paths give 0 at invalid positions if min(x)<=0,
    and valid values dominate the max otherwise.
    """

    def kernel(ids_ref, len_ref, w_ref, b_ref, out_ref):
        # ids_ref: (tw, L+K-1) int32 (char axis pre-padded with pad id)
        # len_ref: (tw, 1) int32
        # w_ref:   (K*Vp, Cp) bf16   fused (embedding x conv-tap) table
        # b_ref:   (1, Cp) f32
        # out_ref: (tw, Cp) f32      lane-dense (Cp = 128 multiple)
        tw = ids_ref.shape[0]
        kvp = w_ref.shape[0]
        ids = ids_ref[...]                                     # (tw, L+K-1)

        # One-hot im2col indicator z: z[w, t, j*Vp + v] = 1 iff char id at shifted
        # position (t + j) equals v.  Tap j occupies a disjoint 128-aligned lane
        # range, so the per-tap one-hots are summed (never overlap) instead of
        # concatenated along the minor axis.
        lane = jax.lax.broadcasted_iota(jnp.int32, (tw, L, kvp), 2)
        z = jnp.zeros((tw, L, kvp), jnp.bfloat16)
        for j in range(K):                                     # K is small & static
            cid = ids[:, j:j + L] + j * Vp                     # (tw, L)
            hit = cid[:, :, None] == lane                      # (tw, L, K*Vp)
            z = z + jnp.where(hit, 1.0, 0.0).astype(jnp.bfloat16)

        # Embedding lookup + all K conv taps as ONE MXU matmul, f32 accumulation.
        acc = jax.lax.dot_general(
            z, w_ref[...],
            dimension_numbers=(((2,), (0,)), ((), ())),
            preferred_element_type=jnp.float32)                # (tw, L, Cp)
        acc = acc + b_ref[...][:, None, :]                     # bias (1, 1, Cp)

        # length mask + relu + maxpool over char positions.
        pos = jax.lax.broadcasted_iota(jnp.int32, (tw, L, 1), 1)
        valid = pos < len_ref[...][:, None, :]                 # (tw, L, 1)
        acc = jnp.maximum(acc, 0.0)                            # relu
        acc = jnp.where(valid, acc, 0.0)                       # mask padded positions
        out_ref[...] = jnp.max(acc, axis=1)                    # (tw, Cp)

    return kernel


def conv_pool_pallas(word_ids, lengths, emb_table, conv_w, conv_b, *, tw_req=256):
    """word_ids: (NZ, L) int32 char ids; lengths: (NZ,) int; emb_table: (V, E) f32;
    conv_w: (C, E, K) f32; conv_b: (C,) f32.  Returns (NZ, C) f32."""
    NZ, L = word_ids.shape
    V, E = emb_table.shape
    C, _, K = conv_w.shape
    p = (K - 1) // 2
    Lp = L + K - 1
    Cp = 128 * ((C + 127) // 128)      # lane-dense output channels
    Vp = 128 * ((V + 127) // 128)      # 128-aligned one-hot lane block per tap

    # Word tile: large for DMA/grid-overhead efficiency (sweep 256..1024), but capped
    # so the grid keeps >= 2 steps when possible (megacore / v7x second TensorCore).
    half = -(-NZ // 2)
    tw = max(8, min(int(tw_req), 8 * (-(-half // 8))))
    nwp = -(-NZ // tw) * tw
    grid = (nwp // tw,)

    # Precompute the fused (embedding x conv-tap) table:
    #   W_comb[j, v, c] = sum_e emb_table[v, e] * conv_w[c, e, j]
    # nn.Embedding(padding_idx=pad) guarantees emb_table[pad] == 0, so the pad row
    # (used both for the conv 'same'-padding halo and for in-word padding chars)
    # contributes exactly 0 — matching the PyTorch zero-padded conv.
    wc = jnp.einsum("ve,cek->kvc",
                    emb_table.astype(jnp.float32), conv_w.astype(jnp.float32),
                    precision=jax.lax.Precision.HIGHEST)              # (K, V, C)
    wc_p = jnp.zeros((K, Vp, Cp), jnp.float32).at[:, :V, :C].set(wc)
    wc_p = wc_p.reshape(K * Vp, Cp).astype(jnp.bfloat16)              # (K*Vp, Cp)
    b_p = jnp.zeros((1, Cp), jnp.float32).at[0, :C].set(conv_b.astype(jnp.float32))

    # Only the tiny int32 id tensor is padded/streamed — no (NZ, L, E) activation
    # tensor and no full-size halo copy in HBM.
    ids_p = jnp.zeros((nwp, Lp), jnp.int32).at[:NZ, p:p + L].set(
        jnp.asarray(word_ids, jnp.int32))
    len_p = jnp.zeros((nwp, 1), jnp.int32).at[:NZ, 0].set(
        jnp.asarray(lengths, jnp.int32))

    # Per-step VMEM (tw=256, L<=32): ids ~70 KB, bf16 one-hot ~6 MB, f32 acc ~4 MB,
    # weights ~100 KB — well under the 32 MiB scoped default (and v7x's 64 MiB).
    # If tw is pushed past ~512 with long words, chunk L and keep a running (tw, Cp)
    # max instead of materializing acc.
    out = pl.pallas_call(
        _make_kernel(L, K, Vp),
        out_shape=jax.ShapeDtypeStruct((nwp, Cp), jnp.float32),
        grid=grid,
        in_specs=[
            pl.BlockSpec((tw, Lp), lambda i: (i, 0)),
            pl.BlockSpec((tw, 1), lambda i: (i, 0)),
            pl.BlockSpec((K * Vp, Cp), lambda i: (0, 0)),
            pl.BlockSpec((1, Cp), lambda i: (0, 0)),
        ],
        out_specs=pl.BlockSpec((tw, Cp), lambda i: (i, 0)),
        compiler_params=pltpu.CompilerParams(dimension_semantics=("parallel",)),
    )(ids_p, len_p, wc_p, b_p)
    return out[:NZ, :C]


# ------------------------------ module forward --------------------------------

def cnn_char_embeddings_forward(sentence_batch, vocab, params):
    # TODO(synk): host-side string tokenization / sort / unsort has no Pallas
    # equivalent; it stays numpy glue exactly mirroring the PyTorch module.
    padded_words, lengths, unsort_idx, _ = prepare(sentence_batch, vocab)
    non_zero_words, non_zero_lengths = remove_pad_words(padded_words, lengths)

    pooled = conv_pool_pallas(
        non_zero_words, non_zero_lengths,
        params["emb_table"], params["conv_w"], params["conv_b"])

    C = params["conv_w"].shape[0]
    n_total, n_nz = len(lengths), len(non_zero_lengths)
    x = jnp.concatenate(
        [pooled, jnp.zeros((n_total - n_nz, C), dtype=pooled.dtype)], axis=0)
    x = x[jnp.asarray(unsort_idx)]
    x = x.reshape(len(sentence_batch), -1, C)
    return x


# -------------------------- pure-JAX exact reference ---------------------------

def reference_conv_pool(word_ids, lengths, emb_table, conv_w, conv_b):
    """Literal translation of the PyTorch hot path (incl. the min(x) fill)."""
    C, E, K = conv_w.shape
    p = (K - 1) // 2
    emb = emb_table[jnp.asarray(word_ids, jnp.int32)]          # (NZ, L, E)
    x = jnp.transpose(emb, (0, 2, 1))                          # NCL
    y = jax.lax.conv_general_dilated(
        x, conv_w, window_strides=(1,), padding=[(p, p)],
        dimension_numbers=("NCH", "OIH", "NCH"),
        precision=jax.lax.Precision.HIGHEST) + conv_b[None, :, None]
    L = emb.shape[1]
    pos = jnp.arange(L)[None, None, :]
    lens = jnp.asarray(lengths)[:, None, None]
    mask = (pos < lens).astype(y.dtype)
    x_min = (pos >= lens).astype(y.dtype) * jnp.min(y)
    y = y * mask + x_min
    y = jax.nn.relu(y)
    return jnp.max(y, axis=2)


# ----------------------------------- main --------------------------------------

if __name__ == "__main__":
    # Small, deterministic configuration.
    E = 32     # cnn_embeddings_size
    K = 3      # cnn_ce_kernel_size (odd, as required by the module)
    C = 64     # cnn_ce_out_channels

    vocab = Vocab("abcdefghijklmnopqrstuvwxyz")
    sentence_batch = [
        ["hello", "tpu", "pallas"],
        ["jax", "rocks"],
    ]

    key = jax.random.PRNGKey(0)
    k1, k2, k3 = jax.random.split(key, 3)
    emb_table = jax.random.normal(k1, (len(vocab), E), dtype=jnp.float32) * 0.1
    emb_table = emb_table.at[vocab.pad].set(0.0)               # padding_idx row = 0
    conv_w = jax.random.normal(k2, (C, E, K), dtype=jnp.float32) * 0.1
    conv_b = jax.random.normal(k3, (C,), dtype=jnp.float32) * 0.1
    params = {"emb_table": emb_table, "conv_w": conv_w, "conv_b": conv_b}

    out = cnn_char_embeddings_forward(sentence_batch, vocab, params)
    out = jax.block_until_ready(out)
    assert out.shape == (len(sentence_batch), 3, C), out.shape

    # Cross-check the Pallas hot path against the literal PyTorch-semantics reference.
    padded_words, lengths, unsort_idx, _ = prepare(sentence_batch, vocab)
    nz_words, nz_lengths = remove_pad_words(padded_words, lengths)
    ref = reference_conv_pool(nz_words, nz_lengths, emb_table, conv_w, conv_b)
    got = conv_pool_pallas(nz_words, nz_lengths, emb_table, conv_w, conv_b)
    got = jax.block_until_ready(got)
    # bf16 fused-weight table (f32 accumulation) -> slightly looser tolerance.
    np.testing.assert_allclose(np.asarray(got), np.asarray(ref), atol=3e-3, rtol=3e-2)

    print("KERNEL_OK")
</pallas_src>

<mosaic_0001>
module attributes {stable_mosaic.version = 11 : i64} {
  func.func @kernel(%arg0: i32, %arg1: memref<8x8xi32, #tpu.memory_space<vmem>>, %arg2: memref<8x1xi32, #tpu.memory_space<vmem>>, %arg3: memref<384x128xbf16, #tpu.memory_space<vmem>>, %arg4: memref<1x128xf32, #tpu.memory_space<vmem>>, %arg5: memref<8x128xf32, #tpu.memory_space<vmem>>) attributes {dimension_semantics = [#tpu.dimension_semantics<parallel>], iteration_bounds = array<i64: 1>, scalar_prefetch = 0 : i64, scratch_operands = 0 : i64, tpu.core_type = #tpu.core_type<tc>, window_params = [{transform_indices = @transform_0, window_bounds = array<i64: 8, 8>}, {transform_indices = @transform_1, window_bounds = array<i64: 8, 1>}, {pipeline_mode = #tpu.pipeline_mode<synchronous>, transform_indices = @transform_2, window_bounds = array<i64: 384, 128>}, {pipeline_mode = #tpu.pipeline_mode<synchronous>, transform_indices = @transform_3, window_bounds = array<i64: 1, 128>}, {transform_indices = @transform_4, window_bounds = array<i64: 8, 128>}]} {
    %c0 = arith.constant 0 : index
    %c0_0 = arith.constant 0 : index
    %0 = vector.load %arg1[%c0, %c0_0] : memref<8x8xi32, #tpu.memory_space<vmem>>, vector<8x8xi32>
    %1 = tpu.iota {dimensions = array<i32: 2>} : vector<8x6x384xi32>
    %cst = arith.constant 0.000000e+00 : bf16
    %2 = vector.broadcast %cst : bf16 to vector<8x6x384xbf16>
    %3 = vector.extract_strided_slice %0 {offsets = [0, 0], sizes = [8, 6], strides = [1, 1]} : vector<8x8xi32> to vector<8x6xi32>
    %c0_i32 = arith.constant 0 : i32
    %4 = vector.broadcast %c0_i32 : i32 to vector<8x6xi32>
    %5 = arith.addi %3, %4 : vector<8x6xi32>
    %6 = vector.shape_cast %5 : vector<8x6xi32> to vector<8x6x1xi32>
    %7 = vector.broadcast %6 : vector<8x6x1xi32> to vector<8x6x384xi32>
    %8 = arith.cmpi eq, %7, %1 : vector<8x6x384xi32>
    %cst_1 = arith.constant 1.000000e+00 : f32
    %cst_2 = arith.constant 0.000000e+00 : f32
    %9 = vector.broadcast %cst_1 : f32 to vector<8x6x384xf32>
    %10 = vector.broadcast %cst_2 : f32 to vector<8x6x384xf32>
    %11 = arith.select %8, %9, %10 : vector<8x6x384xi1>, vector<8x6x384xf32>
    %12 = arith.truncf %11 : vector<8x6x384xf32> to vector<8x6x384xbf16>
    %13 = arith.addf %2, %12 : vector<8x6x384xbf16>
    %14 = vector.extract_strided_slice %0 {offsets = [0, 1], sizes = [8, 6], strides = [1, 1]} : vector<8x8xi32> to vector<8x6xi32>
    %c128_i32 = arith.constant 128 : i32
    %15 = vector.broadcast %c128_i32 : i32 to vector<8x6xi32>
    %16 = arith.addi %14, %15 : vector<8x6xi32>
    %17 = vector.shape_cast %16 : vector<8x6xi32> to vector<8x6x1xi32>
    %18 = vector.broadcast %17 : vector<8x6x1xi32> to vector<8x6x384xi32>
    %19 = arith.cmpi eq, %18, %1 : vector<8x6x384xi32>
    %cst_3 = arith.constant 1.000000e+00 : f32
    %cst_4 = arith.constant 0.000000e+00 : f32
    %20 = vector.broadcast %cst_3 : f32 to vector<8x6x384xf32>
    %21 = vector.broadcast %cst_4 : f32 to vector<8x6x384xf32>
    %22 = arith.select %19, %20, %21 : vector<8x6x384xi1>, vector<8x6x384xf32>
    %23 = arith.truncf %22 : vector<8x6x384xf32> to vector<8x6x384xbf16>
    %24 = arith.addf %13, %23 : vector<8x6x384xbf16>
    %25 = vector.extract_strided_slice %0 {offsets = [0, 2], sizes = [8, 6], strides = [1, 1]} : vector<8x8xi32> to vector<8x6xi32>
    %c256_i32 = arith.constant 256 : i32
    %26 = vector.broadcast %c256_i32 : i32 to vector<8x6xi32>
    %27 = arith.addi %25, %26 : vector<8x6xi32>
    %28 = vector.shape_cast %27 : vector<8x6xi32> to vector<8x6x1xi32>
    %29 = vector.broadcast %28 : vector<8x6x1xi32> to vector<8x6x384xi32>
    %30 = arith.cmpi eq, %29, %1 : vector<8x6x384xi32>
    %cst_5 = arith.constant 1.000000e+00 : f32
    %cst_6 = arith.constant 0.000000e+00 : f32
    %31 = vector.broadcast %cst_5 : f32 to vector<8x6x384xf32>
    %32 = vector.broadcast %cst_6 : f32 to vector<8x6x384xf32>
    %33 = arith.select %30, %31, %32 : vector<8x6x384xi1>, vector<8x6x384xf32>
    %34 = arith.truncf %33 : vector<8x6x384xf32> to vector<8x6x384xbf16>
    %35 = arith.addf %24, %34 : vector<8x6x384xbf16>
    %c0_7 = arith.constant 0 : index
    %c0_8 = arith.constant 0 : index
    %36 = vector.load %arg3[%c0_7, %c0_8] : memref<384x128xbf16, #tpu.memory_space<vmem>>, vector<384x128xbf16>
    %cst_9 = arith.constant dense<0.000000e+00> : vector<8x6x128xf32>
    %37 = tpu.matmul %35, %36, %cst_9 {dimension_numbers = #tpu.dot_dimension_numbers<[2], [0], [0, 1], [1], [0, 0, 0, 1, 1, 1], [], []>} : vector<8x6x384xbf16>, vector<384x128xbf16>, vector<8x6x128xf32> -> vector<8x6x128xf32>
    %c0_10 = arith.constant 0 : index
    %c0_11 = arith.constant 0 : index
    %38 = vector.load %arg4[%c0_10, %c0_11] : memref<1x128xf32, #tpu.memory_space<vmem>>, vector<1x128xf32>
    %39 = vector.shape_cast %38 : vector<1x128xf32> to vector<1x1x128xf32>
    %40 = vector.broadcast %39 : vector<1x1x128xf32> to vector<8x6x128xf32>
    %41 = arith.addf %37, %40 : vector<8x6x128xf32>
    %42 = tpu.iota {dimensions = array<i32: 1>} : vector<8x6x1xi32>
    %c0_12 = arith.constant 0 : index
    %c0_13 = arith.constant 0 : index
    %43 = vector.load %arg2[%c0_12, %c0_13] : memref<8x1xi32, #tpu.memory_space<vmem>>, vector<8x1xi32>
    %44 = vector.shape_cast %43 : vector<8x1xi32> to vector<8x1x1xi32>
    %45 = vector.broadcast %44 : vector<8x1x1xi32> to vector<8x6x1xi32>
    %46 = arith.cmpi slt, %42, %45 : vector<8x6x1xi32>
    %cst_14 = arith.constant 0.000000e+00 : f32
    %47 = vector.broadcast %cst_14 : f32 to vector<8x6x128xf32>
    %48 = arith.maximumf %41, %47 : vector<8x6x128xf32>
    %cst_15 = arith.constant 0.000000e+00 : f32
    %49 = vector.shape_cast %46 : vector<8x6x1xi1> to vector<8x6x1xi1>
    %50 = vector.broadcast %49 : vector<8x6x1xi1> to vector<8x6x128xi1>
    %51 = vector.broadcast %cst_15 : f32 to vector<8x6x128xf32>
    %52 = arith.select %50, %48, %51 : vector<8x6x128xi1>, vector<8x6x128xf32>
    %cst_16 = arith.constant dense<0xFF800000> : vector<8x128xf32>
    %53 = vector.multi_reduction <maximumf>, %52, %cst_16 [1] : vector<8x6x128xf32> to vector<8x128xf32>
    %c0_17 = arith.constant 0 : index
    %c0_18 = arith.constant 0 : index
    %54 = vector.load %arg5[%c0_17, %c0_18] : memref<8x128xf32, #tpu.memory_space<vmem>>, vector<8x128xf32>
    tpu.vector_store %arg5[%c0_17, %c0_18], %53 {strides = array<i32>} : memref<8x128xf32, #tpu.memory_space<vmem>>, vector<8x128xf32>,
    return
  }
  func.func @transform_0(%arg0: i32) -> (i32, i32) {
    %c0_i32 = arith.constant 0 : i32
    %c0_i32_0 = arith.constant 0 : i32
    return %arg0, %c0_i32 : i32, i32
  }
  func.func @transform_1(%arg0: i32) -> (i32, i32) {
    %c0_i32 = arith.constant 0 : i32
    %c0_i32_0 = arith.constant 0 : i32
    return %arg0, %c0_i32 : i32, i32
  }
  func.func @transform_2(%arg0: i32) -> (i32, i32) {
    %c0_i32 = arith.constant 0 : i32
    %c0_i32_0 = arith.constant 0 : i32
    %c0_i32_1 = arith.constant 0 : i32
    return %c0_i32, %c0_i32_0 : i32, i32
  }
  func.func @transform_3(%arg0: i32) -> (i32, i32) {
    %c0_i32 = arith.constant 0 : i32
    %c0_i32_0 = arith.constant 0 : i32
    %c0_i32_1 = arith.constant 0 : i32
    return %c0_i32, %c0_i32_0 : i32, i32
  }
  func.func @transform_4(%arg0: i32) -> (i32, i32) {
    %c0_i32 = arith.constant 0 : i32
    %c0_i32_0 = arith.constant 0 : i32
    return %arg0, %c0_i32 : i32, i32
  }
}

</mosaic_0001>

<bundles_post_ra>
// kernel: tpu_custom_call.1
= control target key start
LH: loop header
LB: loop body
LE: loop exit
PB: predicated region body
PF: predicated region fallthrough
CT: control target
= control target key end

     0   :  { %9 = vsyncpa [#allocation3], 0  ;;  %s2639_s0 = inlined_call_operand.vmem [shape: s32[8,8], index: 0, kind: input, shape index: {}]   ;;  %s2640_s1 = inlined_call_operand.vmem [shape: s32[8,1], index: 1, kind: input, shape index: {}]   ;;  %s2641_s2 = inlined_call_operand.hbm [shape: bf16[384,128], index: 2, kind: input, shape index: {}]   ;;  %s2642_s3 = inlined_call_operand.vmem [shape: f32[1,128], index: 3, kind: input, shape index: {}]   ;;  %s2643_s4 = inlined_call_operand.hbm [shape: f32[8,128], index: 4, kind: output, shape index: {}]  }
   0x1   :  { %10 = vsyncpa [#allocation4], 0  ;;  %s2094_s15 = smov [#allocation2]   ;;  %s2046_s19 = scalar_lea.hbm %s2641_s2, 3072 }
   0x2   :  { %s20_s16 = sshll.u32 %s2094_s15, 4  ;;  %p2047_p0 = scmp.ne.s32.totalorder %s2641_s2, %s2046_s19  ;;  %s21_s16 = int_to_ptr.vmem [resolvable:$true] %s20_s16 }
   0x3   :  { %p2050_p1 = scmp.lt.u32.totalorder %s2046_s19, %s2641_s2 }
   0x5   :  { %p2052_p2 = pnand %p2050_p1, %p2047_p0 }
   0x7   :  { %2055 = shalt.err (!%p2052_p2)
}
   0x8   :  { %s2056_s24 = scalar_lea.vmem %s21_s16, 3072  ;;  %p2061_p4 = scmp.lt.s32.totalorder %s21_s16, %s21_s16 }
   0x9   :  { %p2057_p3 = scmp.ne.s32.totalorder %s21_s16, %s2056_s24  ;;  %p2062_p5 = scmp.lt.s32.totalorder %s2056_s24, %s2056_s24 }
   0xb   :  { %p2063_p6 = por %p2062_p5, %p2061_p4 }
   0xd   :  { %p2064_p7 = pnand %p2063_p6, %p2057_p3 }
   0xf   :  { %2067 = shalt.err (!%p2064_p7)
}
  0x10   :  { %s2095_s25 = smov 64   ;;  %s2096_s26 = smov 4  }
  0x11   :  { %26 = dma.hbm_to_vmem [thread:$0]  %s2641_s2, 3072, %s21_s16, [#allocation3], %s2095_s25, %s2095_s25, %s2096_s26  }
  0x12   :  { %2090 = dma.done.wait [#allocation3], 3072  }
  0x13   :  { %2091 = vsyncadd [#allocation3], 4294964224  ;;  %v34_v0 = vlaneseq  ;;  %v2097_v2 = vmov 0.0   ;;  %v2152_v6 = vld [vmem:[%s2639_s0] sm:$0xff]  ;;  %v2024_v20 = vld [vmem:[#allocation2 + $0x48] sm:$0xff]   ;;  %vm2098_vm0 = vmmov 0  }
  0x14   :  { %1982 = vmatprep.subr.bf16.mxu1 %v2097_v2  ;;  %v2158_v9 = vadd.s32 128, %v2152_v6  ;;  %v2021_v12 = vld [vmem:[#allocation2 + $0x40] sm:$0xff]   ;;  %v2164_v14 = vadd.s32 256, %v2152_v6  ;;  %v2025_v21 = vld [vmem:[#allocation2 + $0x88] sm:$0xff]   ;;  %v2027_v30 = vld [vmem:[#allocation2 + $0x50] sm:$0xff]   ;;  %1998 = vmatprep.mubr.msk.bf16.mxu1 %vm2098_vm0, %v2097_v2 }
  0x15   :  { %v2141_v1 = vshrl.u32 %v34_v0, 7  ;;  %v2022_v13 = vld [vmem:[#allocation2 + $0x80] sm:$0xff]   ;;  %1937 = vmatprep.subr.bf16.mxu0 %v2021_v12  ;;  %v2026_v25 = vld [vmem:[#allocation2 + $0x8] sm:$0xff]   ;;  %v2028_v31 = vld [vmem:[#allocation2 + $0x90] sm:$0xff]   ;;  %v2099_v62 = vmov 1966171168  }
  0x16   :  { %v2023_v15 = vld [vmem:[#allocation2] sm:$0xff]   ;;  %1983 = vmatpush3.bf16.msra.mxu1 %v2022_v13  ;;  %v2029_v32 = vld [vmem:[#allocation2 + $0x10] sm:$0xff]   ;;  %v2030_v35 = vld [vmem:[#allocation2 + $0x58] sm:$0xff]   ;;  %v592_v63 = vunpack.c.l.s4 %v2099_v62 }
  0x17   :  { %v54_v3 = vsub.s32 2, %v2141_v1  ;;  %v2146_v4 = vsub.s32 0, %v2141_v1  ;;  %v47_v5 = vsub.s32 1, %v2141_v1  ;;  %1938 = vmatpush3.bf16.msra.mxu0 %v2023_v15  ;;  %1984 = vmatprep.subr.bf16.mxu1 %v2097_v2  ;;  %v61_v18 = vsub.s32 3, %v2141_v1  ;;  %v2031_v36 = vld [vmem:[#allocation2 + $0x98] sm:$0xff]   ;;  %v2033_v44 = vld [vmem:[#allocation2 + $0x60] sm:$0xff]  }
  0x18   :  { %v75_v19 = vsub.s32 5, %v2141_v1  ;;  %v68_v24 = vsub.s32 4, %v2141_v1  ;;  %1939 = vmatprep.subr.bf16.mxu0 %v2024_v20  ;;  %v2032_v37 = vld [vmem:[#allocation2 + $0x18] sm:$0xff]   ;;  %v89_v42 = vsub.s32 7, %v2141_v1  ;;  %v82_v43 = vsub.s32 6, %v2141_v1  ;;  %v2034_v45 = vld [vmem:[#allocation2 + $0xa0] sm:$0xff]  }
  0x19   :  { %v55_v7 = vrot.slane %v2152_v6, %v54_v3  ;;  %v41_v8 = vrot.slane %v2152_v6, %v2146_v4  ;;  %v194_v10 = vrot.slane %v2158_v9, %v2146_v4  ;;  %v48_v11 = vrot.slane %v2152_v6, %v47_v5  ;;  %v2035_v46 = vld [vmem:[#allocation2 + $0x20] sm:$0xff]   ;;  %v2036_v49 = vld [vmem:[#allocation2 + $0x68] sm:$0xff]   ;;  %v2039_v56 = vld [vmem:[#allocation2 + $0x70] sm:$0xff]  }
  0x1a   :  { %v210_v16 = vrot.slane %v2158_v9, %v54_v3  ;;  %v202_v17 = vrot.slane %v2158_v9, %v47_v5  ;;  %v363_v22 = vrot.slane %v2164_v14, %v47_v5  ;;  %v355_v23 = vrot.slane %v2164_v14, %v2146_v4  ;;  %1985 = vmatpush3.bf16.msra.mxu1 %v2025_v21  ;;  %v2037_v50 = vld [vmem:[#allocation2 + $0xa8] sm:$0xff]   ;;  %v2040_v57 = vld [vmem:[#allocation2 + $0xb0] sm:$0xff]   ;;  %v2042_v59 = vld [vmem:[#allocation2 + $0x78] sm:$0xff]  }
  0x1b   :  { %57 = vbcast.lane.b32.xlu1 %v55_v7, 256  ;;  %43 = vbcast.lane.b32.xlu0 %v41_v8, 256  ;;  %v62_v26 = vrot.slane %v2152_v6, %v61_v18  ;;  %v371_v27 = vrot.slane %v2164_v14, %v54_v3  ;;  %v76_v28 = vrot.slane %v2152_v6, %v75_v19  ;;  %v2038_v53 = vld [vmem:[#allocation2 + $0x28] sm:$0xff]   ;;  %v2041_v58 = vld [vmem:[#allocation2 + $0x30] sm:$0xff]   ;;  %v2043_v60 = vld [vmem:[#allocation2 + $0xb8] sm:$0xff]   ;;  %v593_v3 = vunpack.c.0.s8 %v592_v63 }
  0x1c   :  { %1940 = vmatpush3.bf16.msra.mxu0 %v2026_v25  ;;  %1986 = vmatprep.subr.bf16.mxu1 %v2097_v2  ;;  %v69_v29 = vrot.slane %v2152_v6, %v68_v24  ;;  %v226_v33 = vrot.slane %v2158_v9, %v68_v24  ;;  %v218_v34 = vrot.slane %v2158_v9, %v61_v18  ;;  %v2044_v61 = vld [vmem:[#allocation2 + $0x38] sm:$0xff]   ;;  %v2100_v7 = vmov 0  }
  0x1d   :  { %1941 = vmatprep.subr.bf16.mxu0 %v2027_v30  ;;  %v379_v38 = vrot.slane %v2164_v14, %v61_v18  ;;  %v234_v39 = vrot.slane %v2158_v9, %v75_v19  ;;  %v395_v40 = vrot.slane %v2164_v14, %v75_v19  ;;  %v387_v41 = vrot.slane %v2164_v14, %v68_v24 }
  0x1e   :  { %1987 = vmatpush3.bf16.msra.mxu1 %v2028_v31  ;;  %v90_v47 = vrot.slane %v2152_v6, %v89_v42  ;;  %v83_v48 = vrot.slane %v2152_v6, %v82_v43  ;;  %v250_v51 = vrot.slane %v2158_v9, %v89_v42  ;;  %v242_v52 = vrot.slane %v2158_v9, %v82_v43  ;;  %v1494_v6 = vld [vmem:[%s2640_s1] sm:$0xff] }
  0x1f   :  { %197 = vbcast.lane.b32.xlu1 %v194_v10, 257  ;;  %50 = vbcast.lane.b32.xlu0 %v48_v11, 256  ;;  %v411_v54 = vrot.slane %v2164_v14, %v89_v42  ;;  %v403_v55 = vrot.slane %v2164_v14, %v82_v43  ;;  %v2202_v5 = vsub.s32 %v593_v3, %v2141_v1 }
  0x20   :  { %1942 = vmatpush3.bf16.msra.mxu0 %v2029_v32  ;;  %1988 = vmatprep.subr.bf16.mxu1 %v2097_v2  ;;  %v1495_v9 = vcombine.high %v1494_v6, %v1494_v6 }
  0x21   :  { %1943 = vmatprep.subr.bf16.mxu0 %v2030_v35  ;;  %2019 = vset.pattern.permute.xlu0 %v2100_v7  ;;  %v1502_v8 = vrot.slane %v1494_v6, %v2202_v5 }
  0x22   :  { %1989 = vmatpush3.bf16.msra.mxu1 %v2031_v36  ;;  %2020 = vset.pattern.permute.xlu1 %v2100_v7  ;;  %v1509_v12 = vrot.slane %v1495_v9, %v2202_v5 }
  0x23   :  { %213 = vbcast.lane.b32.xlu1 %v210_v16, 257  ;;  %205 = vbcast.lane.b32.xlu0 %v202_v17, 257  ;;  %v1518_v10 = vrot.slane %v1502_v8, %v2202_v5  ;;  %v1510_v11 = vcombine.high %v1502_v8, %v1502_v8  ;;  %v2216_v17 = vand.u32 127, %v34_v0 }
  0x24   :  { %1944 = vmatpush3.bf16.msra.mxu0 %v2032_v37  ;;  %1990 = vmatprep.subr.bf16.mxu1 %v2097_v2  ;;  %v1525_v16 = vrot.slane %v1509_v12, %v2202_v5  ;;  %v1511_v18 = vcombine.high %v1509_v12, %v1509_v12 }
  0x25   :  { %1945 = vmatprep.subr.bf16.mxu0 %v2033_v44  ;;  %v1547_v13 = vrot.slane %v1518_v10, %v2146_v4  ;;  %v1532_v14 = vrot.slane %v1510_v11, %v2202_v5  ;;  %v1540_v15 = vcombine.high %v1518_v10, %v1518_v10 }
  0x26   :  { %1991 = vmatpush3.bf16.msra.mxu1 %v2034_v45  ;;  %v1539_v24 = vrot.slane %v1511_v18, %v2202_v5  ;;  %v1541_v25 = vcombine.high %v1525_v16, %v1525_v16 }
  0x27   :  { %366 = vbcast.lane.b32.xlu1 %v363_v22, 258  ;;  %358 = vbcast.lane.b32.xlu0 %v355_v23, 258  ;;  %vm1576_vm1 = vcmp.lt.s32.totalorder %v2141_v1, %v1547_v13  ;;  %v1551_v19 = vrot.slane %v1532_v14, %v2146_v4  ;;  %v1555_v20 = vrot.slane %v1540_v15, %v2146_v4 }
  0x28   :  { %1946 = vmatpush3.bf16.msra.mxu0 %v2035_v46  ;;  %1992 = vmatprep.subr.bf16.mxu1 %v2097_v2  ;;  %v1542_v21 = vcombine.high %v1532_v14, %v1532_v14  ;;  %v1608_v22 = vsel %vm1576_vm1, 1, %v2100_v7  ;;  %v1563_v23 = vrot.slane %v1525_v16, %v2146_v4  ;;  %v1571_v30 = vrot.slane %v1541_v25, %v2146_v4 }
  0x29   :  { %1947 = vmatprep.subr.bf16.mxu0 %v2036_v49  ;;  %vm1577_vm2 = vcmp.lt.s32.totalorder %v2141_v1, %v1551_v19  ;;  %vm1578_vm3 = vcmp.lt.s32.totalorder %v2141_v1, %v1555_v20  ;;  %v1543_v37 = vcombine.high %v1539_v24, %v1539_v24 }
  0x2a   :  { %1993 = vmatpush3.bf16.msra.mxu1 %v2037_v50  ;;  %v1559_v0 = vrot.slane %v1542_v21, %v2146_v4  ;;  %vm1580_vm5 = vcmp.lt.s32.totalorder %v2141_v1, %v1563_v23  ;;  %v1610_v31 = vsel %vm1578_vm3, 1, %v2100_v7  ;;  %vm1582_vm7 = vcmp.lt.s32.totalorder %v2141_v1, %v1571_v30 }
  0x2b   :  { %64 = vbcast.lane.b32.xlu1 %v62_v26, 256  ;;  %374 = vbcast.lane.b32.xlu0 %v371_v27, 258  ;;  %v2228_v26 = vadd.s32 128, %v2216_v17  ;;  %v1609_v27 = vsel %vm1577_vm2, 1, %v2100_v7  ;;  %v1612_v35 = vsel %vm1580_vm5, 1, %v2100_v7  ;;  %v1614_v50 = vsel %vm1582_vm7, 1, %v2100_v7 }
  0x2c   :  { %1948 = vmatpush3.bf16.msra.mxu0 %v2038_v53  ;;  %1994 = vmatprep.subr.bf16.mxu1 %v2097_v2  ;;  %vm1579_vm4 = vcmp.lt.s32.totalorder %v2141_v1, %v1559_v0 }
  0x2d   :  { %1949 = vmatprep.subr.bf16.mxu0 %v2039_v56  ;;  %v1611_v32 = vsel %vm1579_vm4, 1, %v2100_v7 }
  0x2e   :  { %1995 = vmatpush3.bf16.msra.mxu1 %v2040_v57 }
  0x2f   :  { %78 = vbcast.lane.b32.xlu1 %v76_v28, 256  ;;  %71 = vbcast.lane.b32.xlu0 %v69_v29, 256  ;;  %v1567_v28 = vrot.slane %v1539_v24, %v2146_v4  ;;  %v2233_v29 = vadd.s32 256, %v2216_v17 }
  0x30   :  { %1950 = vmatpush3.bf16.msra.mxu0 %v2041_v58  ;;  %1996 = vmatprep.subr.bf16.mxu1 %v2097_v2 }
  0x31   :  { %1951 = vmatprep.subr.bf16.mxu0 %v2042_v59  ;;  %vm1581_vm6 = vcmp.lt.s32.totalorder %v2141_v1, %v1567_v28 }
  0x32   :  { %1997 = vmatpush3.bf16.msra.mxu1 %v2043_v60  ;;  %v1613_v36 = vsel %vm1581_vm6, 1, %v2100_v7 }
  0x33   :  { %229 = vbcast.lane.b32.xlu1 %v226_v33, 257  ;;  %221 = vbcast.lane.b32.xlu0 %v218_v34, 257 }
  0x34   :  { %1952 = vmatpush3.bf16.msra.mxu0 %v2044_v61 }
  0x37   :  { %382 = vbcast.lane.b32.xlu1 %v379_v38, 258  ;;  %237 = vbcast.lane.b32.xlu0 %v234_v39, 257 }
  0x3b   :  { %398 = vbcast.lane.b32.xlu1 %v395_v40, 258  ;;  %390 = vbcast.lane.b32.xlu0 %v387_v41, 258 }
  0x3f   :  { %92 = vbcast.lane.b32.xlu1 %v90_v47, 256  ;;  %85 = vbcast.lane.b32.xlu0 %v83_v48, 256 }
  0x43   :  { %253 = vbcast.lane.b32.xlu1 %v250_v51, 257  ;;  %245 = vbcast.lane.b32.xlu0 %v242_v52, 257  ;;  %v2260_v51 = vrot.slane %v1543_v37, %v2146_v4 }
  0x47   :  { %414 = vbcast.lane.b32.xlu1 %v411_v54, 258  ;;  %406 = vbcast.lane.b32.xlu0 %v403_v55, 258 }
  0x4b   :  { %1617 = vperm.xlu0 %2019, %v1608_v22   ;;  %1620 = vperm.xlu1 %2020, %v1609_v27  }
  0x4f   :  { %1626 = vperm.xlu0 %2019, %v1611_v32   ;;  %1623 = vperm.xlu1 %2020, %v1610_v31  }
  0x53   :  { %1632 = vperm.xlu0 %2019, %v1613_v36   ;;  %1629 = vperm.xlu1 %2020, %v1612_v35  }
  0x57   :  { %1635 = vperm.xlu1 %2020, %v1614_v50  }
  0x8d   :  { %v58_v33 = vpop.permute.xlu1 %57  ;;  %v44_v34 = vpop.permute.xlu0 %43 }
  0x8e   :  { %vm100_vm8 = vcmp.eq.s32.totalorder %v58_v33, %v2216_v17  ;;  %vm101_vm9 = vcmp.eq.s32.totalorder %v58_v33, %v2228_v26  ;;  %vm102_vm10 = vcmp.eq.s32.totalorder %v58_v33, %v2233_v29  ;;  %vm94_vm11 = vcmp.eq.s32.totalorder %v44_v34, %v2216_v17 }
  0x8f   :  { %v124_v38 = vsel %vm100_vm8, 1.0, %v2097_v2  ;;  %v125_v39 = vsel %vm101_vm9, 1.0, %v2097_v2  ;;  %v126_v40 = vsel %vm102_vm10, 1.0, %v2097_v2  ;;  %vm95_vm12 = vcmp.eq.s32.totalorder %v44_v34, %v2228_v26 }
  0x90   :  { %v148_v41 = vpack.c.bf16 %v124_v38, %v124_v38  ;;  %v149_v42 = vpack.c.bf16 %v125_v39, %v125_v39  ;;  %vm96_vm13 = vcmp.eq.s32.totalorder %v44_v34, %v2233_v29  ;;  %v150_v43 = vpack.c.bf16 %v126_v40, %v126_v40 }
  0x91   :  { %v118_v44 = vsel %vm94_vm11, 1.0, %v2097_v2  ;;  %v119_v45 = vsel %vm95_vm12, 1.0, %v2097_v2  ;;  %v120_v46 = vsel %vm96_vm13, 1.0, %v2097_v2  ;;  %v198_v47 = vpop.permute.xlu1 %197  ;;  %v51_v54 = vpop.permute.xlu0 %50 }
  0x92   :  { %v172_v48 = vadd.bf16 0, %v148_v41  ;;  %v142_v49 = vpack.c.bf16 %v118_v44, %v118_v44  ;;  %v2262_v52 = vadd.bf16 0, %v149_v42  ;;  %v143_v53 = vpack.c.bf16 %v119_v45, %v119_v45 }
  0x93   :  { %vm255_vm14 = vcmp.eq.s32.totalorder %v198_v47, %v2216_v17  ;;  %vm256_vm15 = vcmp.eq.s32.totalorder %v198_v47, %v2228_v26  ;;  %v144_v55 = vpack.c.bf16 %v120_v46, %v120_v46  ;;  %vm257_vm1 = vcmp.eq.s32.totalorder %v198_v47, %v2233_v29 }
  0x94   :  { %v279_v56 = vsel %vm255_vm14, 1.0, %v2097_v2  ;;  %v280_v57 = vsel %vm256_vm15, 1.0, %v2097_v2  ;;  %v2269_v58 = vadd.bf16 0, %v150_v43  ;;  %v166_v59 = vadd.bf16 0, %v142_v49 }
  0x95   :  { %v281_v4 = vsel %vm257_vm1, 1.0, %v2097_v2  ;;  %v303_v60 = vpack.c.bf16 %v279_v56, %v279_v56  ;;  %v167_v61 = vadd.bf16 0, %v143_v53  ;;  %v304_v62 = vpack.c.bf16 %v280_v57, %v280_v57  ;;  %v214_v63 = vpop.permute.xlu1 %213  ;;  %v206_v15 = vpop.permute.xlu0 %205 }
  0x96   :  { %vm97_vm2 = vcmp.eq.s32.totalorder %v51_v54, %v2216_v17  ;;  %vm98_vm3 = vcmp.eq.s32.totalorder %v51_v54, %v2228_v26  ;;  %v305_v3 = vpack.c.bf16 %v281_v4, %v281_v4  ;;  %vm99_vm4 = vcmp.eq.s32.totalorder %v51_v54, %v2233_v29 }
  0x97   :  { %v121_v6 = vsel %vm97_vm2, 1.0, %v2097_v2  ;;  %v122_v8 = vsel %vm98_vm3, 1.0, %v2097_v2  ;;  %v168_v9 = vadd.bf16 0, %v144_v55  ;;  %v327_v10 = vadd.bf16 %v303_v60, %v166_v59 }
  0x98   :  { %v123_v11 = vsel %vm99_vm4, 1.0, %v2097_v2  ;;  %v145_v12 = vpack.c.bf16 %v121_v6, %v121_v6  ;;  %v146_v13 = vpack.c.bf16 %v122_v8, %v122_v8  ;;  %vm261_vm5 = vcmp.eq.s32.totalorder %v214_v63, %v2216_v17 }
  0x99   :  { %v147_v14 = vpack.c.bf16 %v123_v11, %v123_v11  ;;  %vm262_vm6 = vcmp.eq.s32.totalorder %v214_v63, %v2228_v26  ;;  %v328_v16 = vadd.bf16 %v304_v62, %v167_v61  ;;  %vm263_vm7 = vcmp.eq.s32.totalorder %v214_v63, %v2233_v29  ;;  %v367_v0 = vpop.permute.xlu1 %366  ;;  %v359_v37 = vpop.permute.xlu0 %358 }
  0x9a   :  { %v285_v18 = vsel %vm261_vm5, 1.0, %v2097_v2  ;;  %v286_v19 = vsel %vm262_vm6, 1.0, %v2097_v2  ;;  %v329_v20 = vadd.bf16 %v305_v3, %v168_v9  ;;  %v169_v21 = vadd.bf16 0, %v145_v12 }
  0x9b   :  { %v2284_v22 = vsel %vm263_vm7, 1.0, %v2097_v2  ;;  %v309_v23 = vpack.c.bf16 %v285_v18, %v285_v18  ;;  %v170_v24 = vadd.bf16 0, %v146_v13  ;;  %v171_v25 = vadd.bf16 0, %v147_v14 }
  0x9c   :  { %vm258_vm8 = vcmp.eq.s32.totalorder %v206_v15, %v2216_v17  ;;  %vm259_vm9 = vcmp.eq.s32.totalorder %v206_v15, %v2228_v26  ;;  %v310_v27 = vpack.c.bf16 %v286_v19, %v286_v19  ;;  %vm260_vm10 = vcmp.eq.s32.totalorder %v206_v15, %v2233_v29 }
  0x9d   :  { %v282_v28 = vsel %vm258_vm8, 1.0, %v2097_v2  ;;  %v283_v30 = vsel %vm259_vm9, 1.0, %v2097_v2  ;;  %v311_v31 = vpack.c.bf16 %v2284_v22, %v2284_v22  ;;  %v2293_v32 = vadd.bf16 %v309_v23, %v172_v48  ;;  %v65_v47 = vpop.permute.xlu1 %64  ;;  %v375_v62 = vpop.permute.xlu0 %374 }
  0x9e   :  { %v284_v33 = vsel %vm260_vm10, 1.0, %v2097_v2  ;;  %v306_v34 = vpack.c.bf16 %v282_v28, %v282_v28  ;;  %v307_v35 = vpack.c.bf16 %v283_v30, %v283_v30  ;;  %vm419_vm11 = vcmp.eq.s32.totalorder %v367_v0, %v2216_v17 }
  0x9f   :  { %v308_v36 = vpack.c.bf16 %v284_v33, %v284_v33  ;;  %vm420_vm12 = vcmp.eq.s32.totalorder %v367_v0, %v2228_v26  ;;  %vm421_vm13 = vcmp.eq.s32.totalorder %v367_v0, %v2233_v29  ;;  %v443_v39 = vsel %vm419_vm11, 1.0, %v2097_v2 }
  0xa0   :  { %v330_v38 = vadd.bf16 %v306_v34, %v169_v21  ;;  %v444_v40 = vsel %vm420_vm12, 1.0, %v2097_v2  ;;  %v331_v41 = vadd.bf16 %v307_v35, %v170_v24  ;;  %v445_v43 = vsel %vm421_vm13, 1.0, %v2097_v2 }
  0xa1   :  { %v332_v42 = vadd.bf16 %v308_v36, %v171_v25  ;;  %v467_v44 = vpack.c.bf16 %v443_v39, %v443_v39  ;;  %v468_v45 = vpack.c.bf16 %v444_v40, %v444_v40  ;;  %v469_v46 = vpack.c.bf16 %v445_v43, %v445_v43  ;;  %v79_v18 = vpop.permute.xlu1 %78  ;;  %v72_v33 = vpop.permute.xlu0 %71 }
  0xa2   :  { %vm416_vm14 = vcmp.eq.s32.totalorder %v359_v37, %v2216_v17  ;;  %vm417_vm15 = vcmp.eq.s32.totalorder %v359_v37, %v2228_v26  ;;  %vm418_vm1 = vcmp.eq.s32.totalorder %v359_v37, %v2233_v29  ;;  %vm103_vm2 = vcmp.eq.s32.totalorder %v65_v47, %v2216_v17 }
  0xa3   :  { %v491_v48 = vadd.bf16 %v467_v44, %v330_v38  ;;  %v440_v49 = vsel %vm416_vm14, 1.0, %v2097_v2  ;;  %v441_v50 = vsel %vm417_vm15, 1.0, %v2097_v2  ;;  %v492_v53 = vadd.bf16 %v468_v45, %v331_v41 }
  0xa4   :  { %v493_v54 = vadd.bf16 %v469_v46, %v332_v42  ;;  %v442_v55 = vsel %vm418_vm1, 1.0, %v2097_v2  ;;  %v464_v56 = vpack.c.bf16 %v440_v49, %v440_v49  ;;  %v465_v57 = vpack.c.bf16 %v441_v50, %v441_v50 }
  0xa5   :  { %v466_v59 = vpack.c.bf16 %v442_v55, %v442_v55  ;;  %vm104_vm3 = vcmp.eq.s32.totalorder %v65_v47, %v2228_v26  ;;  %v622_v4 = vcombine.low %v491_v48, %v492_v53  ;;  %vm105_vm4 = vcmp.eq.s32.totalorder %v65_v47, %v2233_v29  ;;  %v230_v43 = vpop.permute.xlu1 %229 }
  0xa6   :  { %v2311_v60 = vrot.slane %v493_v54, %v2202_v5  ;;  %v488_v61 = vadd.bf16 %v464_v56, %v327_v10  ;;  %v489_v63 = vadd.bf16 %v465_v57, %v328_v16  ;;  %v127_v6 = vsel %vm103_vm2, 1.0, %v2097_v2  ;;  %v222_v56 = vpop.permute.xlu0 %221 }
  0xa7   :  { %v490_v3 = vadd.bf16 %v466_v59, %v329_v20  ;;  %v128_v8 = vsel %vm104_vm3, 1.0, %v2097_v2  ;;  %v2317_v9 = vrot.slane %v622_v4, %v2202_v5  ;;  %v129_v11 = vsel %vm105_vm4, 1.0, %v2097_v2 }
  0xa8   :  { %v151_v12 = vpack.c.bf16 %v127_v6, %v127_v6  ;;  %v152_v13 = vpack.c.bf16 %v128_v8, %v128_v8  ;;  %v334_v14 = vadd.bf16 %v310_v27, %v2262_v52  ;;  %v590_v15 = vcombine.low %v488_v61, %v489_v63 }
  0xa9   :  { %v153_v10 = vpack.c.bf16 %v129_v11, %v129_v11  ;;  %vm422_vm5 = vcmp.eq.s32.totalorder %v375_v62, %v2216_v17  ;;  %v335_v16 = vadd.bf16 %v311_v31, %v2269_v58  ;;  %v637_v19 = vcombine.low %v2317_v9, %v2311_v60 }
  0xaa   :  { %v638_v20 = vcombine.high %v2317_v9, %v2311_v60  ;;  %v2328_v21 = vrot.slane %v490_v3, %v2202_v5  ;;  %v2330_v22 = vadd.bf16 0, %v151_v12  ;;  %v2332_v23 = vadd.bf16 0, %v152_v13  ;;  %v383_v13 = vpop.permute.xlu1 %382 }
  0xab   :  { %vm423_vm6 = vcmp.eq.s32.totalorder %v375_v62, %v2228_v26  ;;  %vm424_vm7 = vcmp.eq.s32.totalorder %v375_v62, %v2233_v29  ;;  %v446_v52 = vsel %vm422_vm5, 1.0, %v2097_v2  ;;  %vm109_vm8 = vcmp.eq.s32.totalorder %v79_v18, %v2216_v17 }
  0xac   :  { %v447_v58 = vsel %vm423_vm6, 1.0, %v2097_v2  ;;  %v448_v24 = vsel %vm424_vm7, 1.0, %v2097_v2  ;;  %v2341_v25 = vrot.slane %v590_v15, %v2202_v5  ;;  %v2343_v0 = vadd.bf16 0, %v153_v10 }
  0xad   :  { %v470_v27 = vpack.c.bf16 %v446_v52, %v446_v52  ;;  %v471_v28 = vpack.c.bf16 %v447_v58, %v447_v58  ;;  %v472_v30 = vpack.c.bf16 %v448_v24, %v448_v24  ;;  %vm110_vm9 = vcmp.eq.s32.totalorder %v79_v18, %v2228_v26 }
  0xae   :  { %vm111_vm10 = vcmp.eq.s32.totalorder %v79_v18, %v2233_v29  ;;  %v133_v31 = vsel %vm109_vm8, 1.0, %v2097_v2  ;;  %v134_v36 = vsel %vm110_vm9, 1.0, %v2097_v2  ;;  %vm106_vm11 = vcmp.eq.s32.totalorder %v72_v33, %v2216_v17 }
  0xaf   :  { %v494_v34 = vadd.bf16 %v470_v27, %v2293_v32  ;;  %v495_v35 = vadd.bf16 %v471_v28, %v334_v14  ;;  %v135_v37 = vsel %vm111_vm10, 1.0, %v2097_v2  ;;  %v496_v38 = vadd.bf16 %v472_v30, %v335_v16  ;;  %v238_v28 = vpop.permute.xlu0 %237 }
  0xb0   :  { %v157_v39 = vpack.c.bf16 %v133_v31, %v133_v31  ;;  %v158_v40 = vpack.c.bf16 %v134_v36, %v134_v36  ;;  %v159_v41 = vpack.c.bf16 %v135_v37, %v135_v37  ;;  %vm107_vm12 = vcmp.eq.s32.totalorder %v72_v33, %v2228_v26 }
  0xb1   :  { %v654_v42 = vcombine.low %v494_v34, %v495_v35  ;;  %vm108_vm13 = vcmp.eq.s32.totalorder %v72_v33, %v2233_v29  ;;  %v605_v32 = vcombine.low %v2341_v25, %v2328_v21  ;;  %v606_v44 = vcombine.high %v2341_v25, %v2328_v21 }
  0xb2   :  { %v2359_v45 = vrot.slane %v496_v38, %v2202_v5  ;;  %v2361_v46 = vadd.bf16 0, %v157_v39  ;;  %v130_v48 = vsel %vm106_vm11, 1.0, %v2097_v2  ;;  %v131_v49 = vsel %vm107_vm12, 1.0, %v2097_v2 }
  0xb3   :  { %v2364_v47 = vrot.slane %v654_v42, %v2202_v5  ;;  %v132_v50 = vsel %vm108_vm13, 1.0, %v2097_v2  ;;  %v154_v53 = vpack.c.bf16 %v130_v48, %v130_v48  ;;  %v155_v54 = vpack.c.bf16 %v131_v49, %v131_v49 }
  0xb4   :  { %v156_v55 = vpack.c.bf16 %v132_v50, %v132_v50  ;;  %vm267_vm14 = vcmp.eq.s32.totalorder %v230_v43, %v2216_v17  ;;  %v182_v57 = vadd.bf16 0, %v158_v40  ;;  %v2370_v59 = vadd.bf16 0, %v159_v41 }
  0xb5   :  { %vm268_vm15 = vcmp.eq.s32.totalorder %v230_v43, %v2228_v26  ;;  %vm269_vm1 = vcmp.eq.s32.totalorder %v230_v43, %v2233_v29  ;;  %v669_v4 = vcombine.low %v2364_v47, %v2359_v45  ;;  %v670_v61 = vcombine.high %v2364_v47, %v2359_v45 }
  0xb6   :  { %v178_v62 = vadd.bf16 0, %v154_v53  ;;  %v291_v63 = vsel %vm267_vm14, 1.0, %v2097_v2  ;;  %v292_v3 = vsel %vm268_vm15, 1.0, %v2097_v2  ;;  %v293_v6 = vsel %vm269_vm1, 1.0, %v2097_v2 }
  0xb7   :  { %v315_v8 = vpack.c.bf16 %v291_v63, %v291_v63  ;;  %vm264_vm2 = vcmp.eq.s32.totalorder %v222_v56, %v2216_v17  ;;  %v179_v11 = vadd.bf16 0, %v155_v54  ;;  %v180_v12 = vadd.bf16 0, %v156_v55  ;;  %v391_v54 = vpop.permute.xlu0 %390 }
  0xb8   :  { %vm265_vm3 = vcmp.eq.s32.totalorder %v222_v56, %v2228_v26  ;;  %vm266_vm4 = vcmp.eq.s32.totalorder %v222_v56, %v2233_v29  ;;  %v316_v14 = vpack.c.bf16 %v292_v3, %v292_v3  ;;  %v288_v15 = vsel %vm264_vm2, 1.0, %v2097_v2 }
  0xb9   :  { %v289_v10 = vsel %vm265_vm3, 1.0, %v2097_v2  ;;  %v290_v18 = vsel %vm266_vm4, 1.0, %v2097_v2  ;;  %v317_v16 = vpack.c.bf16 %v293_v6, %v293_v6  ;;  %v2387_v52 = vadd.bf16 %v315_v8, %v178_v62 }
  0xba   :  { %v312_v58 = vpack.c.bf16 %v288_v15, %v288_v15  ;;  %v313_v24 = vpack.c.bf16 %v289_v10, %v289_v10  ;;  %v314_v27 = vpack.c.bf16 %v290_v18, %v290_v18  ;;  %vm425_vm5 = vcmp.eq.s32.totalorder %v383_v13, %v2216_v17 }
  0xbb   :  { %vm426_vm6 = vcmp.eq.s32.totalorder %v383_v13, %v2228_v26  ;;  %vm427_vm7 = vcmp.eq.s32.totalorder %v383_v13, %v2233_v29  ;;  %v449_v33 = vsel %vm425_vm5, 1.0, %v2097_v2  ;;  %vm270_vm8 = vcmp.eq.s32.totalorder %v238_v28, %v2216_v17 }
  0xbc   :  { %v336_v30 = vadd.bf16 %v312_v58, %v2330_v22  ;;  %v337_v31 = vadd.bf16 %v313_v24, %v2332_v23  ;;  %v450_v34 = vsel %vm426_vm6, 1.0, %v2097_v2  ;;  %v338_v35 = vadd.bf16 %v314_v27, %v2343_v0  ;;  %v399_v22 = vpop.permute.xlu1 %398 }
  0xbd   :  { %v451_v36 = vsel %vm427_vm7, 1.0, %v2097_v2  ;;  %v473_v37 = vpack.c.bf16 %v449_v33, %v449_v33  ;;  %v474_v38 = vpack.c.bf16 %v450_v34, %v450_v34  ;;  %vm271_vm9 = vcmp.eq.s32.totalorder %v238_v28, %v2228_v26 }
  0xbe   :  { %v475_v39 = vpack.c.bf16 %v451_v36, %v451_v36  ;;  %vm272_vm10 = vcmp.eq.s32.totalorder %v238_v28, %v2233_v29  ;;  %v294_v41 = vsel %vm270_vm8, 1.0, %v2097_v2  ;;  %v295_v42 = vsel %vm271_vm9, 1.0, %v2097_v2 }
  0xbf   :  { %v497_v40 = vadd.bf16 %v473_v37, %v336_v30  ;;  %v498_v23 = vadd.bf16 %v474_v38, %v337_v31  ;;  %v296_v0 = vsel %vm272_vm10, 1.0, %v2097_v2  ;;  %v318_v48 = vpack.c.bf16 %v294_v41, %v294_v41 }
  0xc0   :  { %v499_v43 = vadd.bf16 %v475_v39, %v338_v35  ;;  %v319_v49 = vpack.c.bf16 %v295_v42, %v295_v42  ;;  %v320_v53 = vpack.c.bf16 %v296_v0, %v296_v0  ;;  %vm431_vm11 = vcmp.eq.s32.totalorder %v399_v22, %v2216_v17  ;;  %v86_v39 = vpop.permute.xlu0 %85 }
  0xc1   :  { %v686_v50 = vcombine.low %v497_v40, %v498_v23  ;;  %vm432_vm12 = vcmp.eq.s32.totalorder %v399_v22, %v2228_v26  ;;  %v340_v55 = vadd.bf16 %v316_v14, %v179_v11  ;;  %v341_v56 = vadd.bf16 %v317_v16, %v180_v12  ;;  %v93_v16 = vpop.permute.xlu1 %92 }
  0xc2   :  { %v342_v62 = vadd.bf16 %v318_v48, %v2361_v46  ;;  %vm433_vm13 = vcmp.eq.s32.totalorder %v399_v22, %v2233_v29  ;;  %v343_v3 = vadd.bf16 %v319_v49, %v182_v57  ;;  %v455_v6 = vsel %vm431_vm11, 1.0, %v2097_v2 }
  0xc3   :  { %v693_v63 = vrot.slane %v686_v50, %v2202_v5  ;;  %v456_v8 = vsel %vm432_vm12, 1.0, %v2097_v2  ;;  %v457_v13 = vsel %vm433_vm13, 1.0, %v2097_v2  ;;  %v479_v15 = vpack.c.bf16 %v455_v6, %v455_v6 }
  0xc4   :  { %v480_v10 = vpack.c.bf16 %v456_v8, %v456_v8  ;;  %vm428_vm14 = vcmp.eq.s32.totalorder %v391_v54, %v2216_v17  ;;  %v700_v11 = vrot.slane %v499_v43, %v2202_v5  ;;  %v344_v12 = vadd.bf16 %v320_v53, %v2370_v59 }
  0xc5   :  { %v481_v46 = vpack.c.bf16 %v457_v13, %v457_v13  ;;  %vm429_vm15 = vcmp.eq.s32.totalorder %v391_v54, %v2228_v26  ;;  %v503_v14 = vadd.bf16 %v479_v15, %v342_v62  ;;  %vm430_vm1 = vcmp.eq.s32.totalorder %v391_v54, %v2233_v29  ;;  %v254_v62 = vpop.permute.xlu1 %253 }
  0xc6   :  { %v504_v18 = vadd.bf16 %v480_v10, %v343_v3  ;;  %v452_v57 = vsel %vm428_vm14, 1.0, %v2097_v2  ;;  %v701_v58 = vcombine.low %v693_v63, %v700_v11  ;;  %v702_v24 = vcombine.high %v693_v63, %v700_v11 }
  0xc7   :  { %v505_v27 = vadd.bf16 %v481_v46, %v344_v12  ;;  %v453_v28 = vsel %vm429_vm15, 1.0, %v2097_v2  ;;  %v454_v31 = vsel %vm430_vm1, 1.0, %v2097_v2  ;;  %v476_v33 = vpack.c.bf16 %v452_v57, %v452_v57  ;;  %v246_v57 = vpop.permute.xlu0 %245 }
  0xc8   :  { %v750_v30 = vcombine.low %v503_v14, %v504_v18  ;;  %v477_v59 = vpack.c.bf16 %v453_v28, %v453_v28  ;;  %v478_v35 = vpack.c.bf16 %v454_v31, %v454_v31  ;;  %vm115_vm2 = vcmp.eq.s32.totalorder %v93_v16, %v2216_v17 }
  0xc9   :  { %v2421_v34 = vrot.slane %v505_v27, %v2202_v5  ;;  %vm116_vm3 = vcmp.eq.s32.totalorder %v93_v16, %v2228_v26  ;;  %v500_v37 = vadd.bf16 %v476_v33, %v2387_v52  ;;  %vm117_vm4 = vcmp.eq.s32.totalorder %v93_v16, %v2233_v29 }
  0xca   :  { %v2426_v36 = vrot.slane %v750_v30, %v2202_v5  ;;  %v501_v38 = vadd.bf16 %v477_v59, %v340_v55  ;;  %v502_v22 = vadd.bf16 %v478_v35, %v341_v56  ;;  %v139_v40 = vsel %vm115_vm2, 1.0, %v2097_v2 }
  0xcb   :  { %v140_v23 = vsel %vm116_vm3, 1.0, %v2097_v2  ;;  %v141_v41 = vsel %vm117_vm4, 1.0, %v2097_v2  ;;  %v2434_v42 = vrot.slane %v701_v58, %v2202_v5  ;;  %v2437_v43 = vrot.slane %v702_v24, %v2202_v5 }
  0xcc   :  { %v718_v0 = vcombine.low %v500_v37, %v501_v38  ;;  %v163_v48 = vpack.c.bf16 %v139_v40, %v139_v40  ;;  %v765_v52 = vcombine.low %v2426_v36, %v2421_v34  ;;  %v164_v49 = vpack.c.bf16 %v140_v23, %v140_v23 }
  0xcd   :  { %v165_v50 = vpack.c.bf16 %v141_v41, %v141_v41  ;;  %vm112_vm5 = vcmp.eq.s32.totalorder %v86_v39, %v2216_v17  ;;  %v766_v53 = vcombine.high %v2426_v36, %v2421_v34  ;;  %v732_v55 = vrot.slane %v502_v22, %v2202_v5 }
  0xce   :  { %v725_v54 = vrot.slane %v718_v0, %v2202_v5  ;;  %v187_v56 = vadd.bf16 0, %v163_v48  ;;  %v188_v63 = vadd.bf16 0, %v164_v49  ;;  %vm113_vm6 = vcmp.eq.s32.totalorder %v86_v39, %v2228_v26 }
  0xcf   :  { %v189_v3 = vadd.bf16 0, %v165_v50  ;;  %vm114_vm7 = vcmp.eq.s32.totalorder %v86_v39, %v2233_v29  ;;  %v136_v13 = vsel %vm112_vm5, 1.0, %v2097_v2  ;;  %v137_v15 = vsel %vm113_vm6, 1.0, %v2097_v2  ;;  %v415_v50 = vpop.permute.xlu1 %414 }
  0xd0   :  { %v733_v6 = vcombine.low %v725_v54, %v732_v55  ;;  %v734_v8 = vcombine.high %v725_v54, %v732_v55  ;;  %v138_v10 = vsel %vm114_vm7, 1.0, %v2097_v2  ;;  %v160_v11 = vpack.c.bf16 %v136_v13, %v136_v13 }
  0xd1   :  { %v161_v12 = vpack.c.bf16 %v137_v15, %v137_v15  ;;  %vm276_vm8 = vcmp.eq.s32.totalorder %v254_v62, %v2216_v17  ;;  %v162_v18 = vpack.c.bf16 %v138_v10, %v138_v10  ;;  %vm277_vm9 = vcmp.eq.s32.totalorder %v254_v62, %v2228_v26 }
  0xd2   :  { %v2453_v46 = vrot.slane %v733_v6, %v2202_v5  ;;  %v2456_v14 = vrot.slane %v734_v8, %v2202_v5  ;;  %v184_v16 = vadd.bf16 0, %v160_v11  ;;  %vm278_vm10 = vcmp.eq.s32.totalorder %v254_v62, %v2233_v29 }
  0xd3   :  { %v185_v58 = vadd.bf16 0, %v161_v12  ;;  %v300_v24 = vsel %vm276_vm8, 1.0, %v2097_v2  ;;  %v186_v27 = vadd.bf16 0, %v162_v18  ;;  %v301_v28 = vsel %vm277_vm9, 1.0, %v2097_v2 }
  0xd4   :  { %v302_v30 = vsel %vm278_vm10, 1.0, %v2097_v2  ;;  %v324_v31 = vpack.c.bf16 %v300_v24, %v300_v24  ;;  %v325_v33 = vpack.c.bf16 %v301_v28, %v301_v28  ;;  %vm273_vm11 = vcmp.eq.s32.totalorder %v246_v57, %v2216_v17 }
  0xd5   :  { %v326_v59 = vpack.c.bf16 %v302_v30, %v302_v30  ;;  %vm274_vm12 = vcmp.eq.s32.totalorder %v246_v57, %v2228_v26  ;;  %vm275_vm13 = vcmp.eq.s32.totalorder %v246_v57, %v2233_v29  ;;  %v297_v37 = vsel %vm273_vm11, 1.0, %v2097_v2 }
  0xd6   :  { %v348_v35 = vadd.bf16 %v324_v31, %v187_v56  ;;  %v298_v38 = vsel %vm274_vm12, 1.0, %v2097_v2  ;;  %v349_v39 = vadd.bf16 %v325_v33, %v188_v63  ;;  %v299_v40 = vsel %vm275_vm13, 1.0, %v2097_v2 }
  0xd7   :  { %v350_v22 = vadd.bf16 %v326_v59, %v189_v3  ;;  %v321_v23 = vpack.c.bf16 %v297_v37, %v297_v37  ;;  %v322_v41 = vpack.c.bf16 %v298_v38, %v298_v38  ;;  %v323_v0 = vpack.c.bf16 %v299_v40, %v299_v40 }
  0xd8   :  { %v613_v48 = vrot.slane %v605_v32, %v2202_v5  ;;  %v620_v49 = vrot.slane %v606_v44, %v2202_v5  ;;  %v645_v55 = vrot.slane %v637_v19, %v2202_v5  ;;  %v652_v56 = vrot.slane %v638_v20, %v2202_v5  ;;  %v407_v20 = vpop.permute.xlu0 %406 }
  0xd9   :  { %v345_v54 = vadd.bf16 %v321_v23, %v184_v16  ;;  %v677_v32 = vrot.slane %v669_v4, %v2202_v5  ;;  %v346_v62 = vadd.bf16 %v322_v41, %v185_v58  ;;  %v347_v21 = vadd.bf16 %v323_v0, %v186_v27 }
  0xda   :  { %v621_v25 = vcombine.high %v613_v48, %v613_v48  ;;  %v684_v44 = vrot.slane %v670_v61, %v2202_v5  ;;  %v653_v63 = vcombine.high %v645_v55, %v645_v55  ;;  %v862_v3 = vcombine.low %v613_v48, %v620_v49 }
  0xdb   :  { %v685_v19 = vcombine.high %v677_v32, %v677_v32  ;;  %vm437_vm14 = vcmp.eq.s32.totalorder %v415_v50, %v2216_v17  ;;  %vm438_vm15 = vcmp.eq.s32.totalorder %v415_v50, %v2228_v26  ;;  %vm439_vm1 = vcmp.eq.s32.totalorder %v415_v50, %v2233_v29 }
  0xdc   :  { %v863_v60 = vcombine.low %v621_v25, %v645_v55  ;;  %v865_v9 = vcombine.low %v677_v32, %v684_v44  ;;  %vm1583_vm2 = vcmp.lt.s32.totalorder %v2141_v1, %v2260_v51  ;;  %v864_v4 = vcombine.low %v652_v56, %v653_v63 }
  0xdd   :  { %v872_v6 = vrot.slane %v862_v3, %v2202_v5  ;;  %v461_v45 = vsel %vm437_vm14, 1.0, %v2097_v2  ;;  %v462_v47 = vsel %vm438_vm15, 1.0, %v2097_v2  ;;  %v463_v13 = vsel %vm439_vm1, 1.0, %v2097_v2 }
  0xde   :  { %v879_v61 = vrot.slane %v863_v60, %v2202_v5  ;;  %v893_v8 = vrot.slane %v865_v9, %v2202_v5  ;;  %v485_v15 = vpack.c.bf16 %v461_v45, %v461_v45  ;;  %v886_v10 = vrot.slane %v864_v4, %v2202_v5 }
  0xdf   :  { %v486_v11 = vpack.c.bf16 %v462_v47, %v462_v47  ;;  %v487_v12 = vpack.c.bf16 %v463_v13, %v463_v13  ;;  %vm434_vm3 = vcmp.eq.s32.totalorder %v407_v20, %v2216_v17  ;;  %vm435_vm4 = vcmp.eq.s32.totalorder %v407_v20, %v2228_v26 }
  0xe0   :  { %v895_v18 = vcombine.high %v872_v6, %v879_v61  ;;  %v894_v57 = vcombine.low %v872_v6, %v879_v61  ;;  %v509_v16 = vadd.bf16 %v485_v15, %v348_v35  ;;  %v897_v58 = vcombine.high %v886_v10, %v893_v8 }
  0xe1   :  { %v896_v24 = vcombine.low %v886_v10, %v893_v8  ;;  %v510_v27 = vadd.bf16 %v486_v11, %v349_v39  ;;  %v511_v28 = vadd.bf16 %v487_v12, %v350_v22  ;;  %vm436_vm5 = vcmp.eq.s32.totalorder %v407_v20, %v2233_v29 }
  0xe2   :  { %v911_v30 = vrot.slane %v895_v18, %v2202_v5  ;;  %v904_v31 = vrot.slane %v894_v57, %v2202_v5  ;;  %v458_v33 = vsel %vm434_vm3, 1.0, %v2097_v2  ;;  %v925_v59 = vrot.slane %v897_v58, %v2202_v5 }
  0xe3   :  { %v918_v17 = vrot.slane %v896_v24, %v2202_v5  ;;  %v814_v37 = vcombine.low %v509_v16, %v510_v27  ;;  %v828_v35 = vrot.slane %v511_v28, %v2202_v5  ;;  %v459_v26 = vsel %vm435_vm4, 1.0, %v2097_v2 }
  0xe4   :  { %v460_v38 = vsel %vm436_vm5, 1.0, %v2097_v2  ;;  %v482_v39 = vpack.c.bf16 %v458_v33, %v458_v33  ;;  %v717_v22 = vcombine.high %v2434_v42, %v2434_v42  ;;  %v928_v40 = vcombine.low %v911_v30, %v925_v59 }
  0xe5   :  { %v927_v23 = vcombine.high %v904_v31, %v918_v17  ;;  %v926_v29 = vcombine.low %v904_v31, %v918_v17  ;;  %v821_v41 = vrot.slane %v814_v37, %v2202_v5  ;;  %v483_v0 = vpack.c.bf16 %v459_v26, %v459_v26 }
  0xe6   :  { %v484_v48 = vpack.c.bf16 %v460_v38, %v460_v38  ;;  %v506_v49 = vadd.bf16 %v482_v39, %v345_v54  ;;  %v749_v50 = vcombine.high %v2453_v46, %v2453_v46  ;;  %v773_v55 = vrot.slane %v765_v52, %v2202_v5  ;;  %1278 = vmatprep.mubr.bf16.mxu0 %v928_v40 }
  0xe7   :  { %1999 = vmatmul.mubr.bf16.vlgmr.msra.gmra.mrb[0].mxu1 %v927_v23  ;;  %v829_v56 = vcombine.low %v821_v41, %v828_v35  ;;  %v929_v32 = vcombine.low %v685_v19, %v2434_v42  ;;  %v1615_v25 = vsel %vm1583_vm2, 1, %v2100_v7  ;;  %1279 = vmatmul.mubr.bf16.vlgmr.msra.gmra.mrb[0].mxu0 %v926_v29  ;;  %v507_v54 = vadd.bf16 %v483_v0, %v346_v62 }
  0xe8   :  { %v508_v44 = vadd.bf16 %v484_v48, %v347_v21  ;;  %2002 = vmatprep.mubr.msk.bf16.mxu1 %vm2098_vm0, %v2097_v2  ;;  %v930_v63 = vcombine.low %v2437_v43, %v717_v22  ;;  %v780_v52 = vrot.slane %v766_v53, %v2202_v5  ;;  %v931_v19 = vcombine.low %v2453_v46, %v2456_v14 }
  0xe9   :  { %v837_v42 = vrot.slane %v829_v56, %v2202_v5  ;;  %v932_v51 = vcombine.low %v749_v50, %v773_v55  ;;  %1638 = vperm.xlu0 %2019, %v1615_v25   ;;  %v830_v7 = vcombine.high %v821_v41, %v828_v35  ;;  %v782_v62 = vcombine.low %v506_v49, %v507_v54  ;;  %v1912_v50 = vld [vmem:[%s2642_s3] ss:$0 sm:$0xff]  ;;  %s2102_s3 = smov [#allocation5]  }
  0xea   :  { %v939_v21 = vrot.slane %v929_v32, %v2202_v5  ;;  %v946_v3 = vrot.slane %v930_v63, %v2202_v5  ;;  %v796_v43 = vrot.slane %v508_v44, %v2202_v5  ;;  %v953_v60 = vrot.slane %v931_v19, %v2202_v5  ;;  %s1903_s6 = sshll.u32 %s2102_s3, 4  ;;  %s1904_s6 = int_to_ptr.vmem [resolvable:$true] %s1903_s6 }
  0xeb   :  { %v960_v34 = vrot.slane %v932_v51, %v2202_v5  ;;  %v781_v36 = vcombine.high %v773_v55, %v773_v55  ;;  %v789_v53 = vrot.slane %v782_v62, %v2202_v5  ;;  %v845_v46 = vcombine.high %v837_v42, %v837_v42  ;;  %s2068_s7 = scalar_lea.vmem %s1904_s6, 128  ;;  %p2073_p9 = scmp.lt.s32.totalorder %s1904_s6, %s1904_s6 }
  0xec   :  { %v962_v9 = vcombine.high %v939_v21, %v946_v3  ;;  %v961_v20 = vcombine.low %v939_v21, %v946_v3  ;;  %v844_v6 = vrot.slane %v830_v7, %v2202_v5  ;;  %v2101_v41 = vmov 1983009808   ;;  %p2069_p8 = scmp.ne.s32.totalorder %s1904_s6, %s2068_s7  ;;  %p2074_p10 = scmp.lt.s32.totalorder %s2068_s7, %s2068_s7 }
  0xed   :  { %v964_v14 = vcombine.high %v953_v60, %v960_v34  ;;  %v963_v4 = vcombine.low %v953_v60, %v960_v34  ;;  %v797_v45 = vcombine.low %v789_v53, %v796_v43  ;;  %v798_v47 = vcombine.high %v789_v53, %v796_v43 }
  0xee   :  { %v996_v61 = vcombine.low %v780_v52, %v781_v36  ;;  %v978_v8 = vrot.slane %v962_v9, %v2202_v5  ;;  %v971_v15 = vrot.slane %v961_v20, %v2202_v5  ;;  %v999_v18 = vcombine.low %v844_v6, %v845_v46  ;;  %p2075_p11 = por %p2074_p10, %p2073_p9 }
  0xef   :  { %v992_v13 = vrot.slane %v964_v14, %v2202_v5  ;;  %v985_v10 = vrot.slane %v963_v4, %v2202_v5  ;;  %v805_v11 = vrot.slane %v797_v45, %v2202_v5  ;;  %v812_v12 = vrot.slane %v798_v47, %v2202_v5 }
  0xf0   :  { %v1006_v28 = vrot.slane %v996_v61, %v2202_v5  ;;  %v1027_v33 = vrot.slane %v999_v18, %v2202_v5  ;;  %v848_v0 = vunpack.c.l.s4 %v2101_v41  ;;  %v846_v55 = vcombine.high %v1912_v50, %v1912_v50  ;;  %p2076_p12 = pnand %p2075_p11, %p2069_p8 }
  0xf1   :  { %v995_v57 = vcombine.low %v978_v8, %v992_v13  ;;  %v994_v16 = vcombine.high %v971_v15, %v985_v10  ;;  %v993_v58 = vcombine.low %v971_v15, %v985_v10  ;;  %v813_v24 = vcombine.high %v805_v11, %v805_v11  ;;  %v1618_v10 = vpop.permute.xlu0 %1617 }
  0xf2   :  { %v997_v27 = vcombine.low %v805_v11, %v812_v12  ;;  %v849_v48 = vunpack.c.0.s8 %v848_v0  ;;  %vm1640_vm6 = vcmp.eq.s32.totalorder %v1618_v10, 1  ;;  %vm1881_vm10 = vcmask 1041409  }
  0xf3   :  { %1286 = vmatprep.mubr.bf16.mxu0 %v995_v57  ;;  %2003 = vmatmul.mubr.bf16.gmra.mrb[4].mxu1 %v994_v16  ;;  %v998_v30 = vcombine.low %v813_v24, %v837_v42  ;;  %vm1883_vm12 = vcmask 1042434   ;;  %vm1885_vm14 = vcmask 1043459   ;;  %vm1887_vm2 = vcmask 1044484  }
  0xf4   :  { %1287 = vmatmul.mubr.bf16.gmra.mrb[4].mxu0 %v993_v58  ;;  %2006 = vmatprep.mubr.msk.bf16.mxu1 %vm2098_vm0, %v2097_v2  ;;  %v1013_v31 = vrot.slane %v997_v27, %v2202_v5  ;;  %v2564_v49 = vsub.s32 %v849_v48, %v2141_v1  ;;  %vm1816_vm0 = vcmask 1045504   ;;  %vm1889_vm3 = vcmask 1045509  }
  0xf5   :  { %v1020_v59 = vrot.slane %v998_v30, %v2202_v5  ;;  %vm1891_vm4 = vcmask 1046534   ;;  %vm1893_vm5 = vcmask 1047559  }
  0xf6   :  { %v1029_v17 = vcombine.high %v1006_v28, %v1013_v31  ;;  %v1028_v37 = vcombine.low %v1006_v28, %v1013_v31  ;;  %v853_v56 = vrot.slane %v1912_v50, %v2564_v49 }
  0xf7   :  { %v1031_v35 = vcombine.high %v1020_v59, %v1027_v33  ;;  %v1030_v26 = vcombine.low %v1020_v59, %v1027_v33 }
  0xf8   :  { %v1045_v38 = vrot.slane %v1029_v17, %v2202_v5  ;;  %v1038_v22 = vrot.slane %v1028_v37, %v2202_v5  ;;  %v861_v32 = vcombine.high %v853_v56, %v853_v56 }
  0xf9   :  { %v1059_v39 = vrot.slane %v1031_v35, %v2202_v5  ;;  %v1052_v40 = vrot.slane %v1030_v26, %v2202_v5  ;;  %v860_v5 = vrot.slane %v846_v55, %v2564_v49 }
  0xfa   :  { %v1216_v25 = vcombine.low %v853_v56, %v861_v32 }
  0xfb   :  { %v1062_v2 = vcombine.low %v1045_v38, %v1059_v39  ;;  %v1061_v23 = vcombine.high %v1038_v22, %v1052_v40  ;;  %v1060_v29 = vcombine.low %v1038_v22, %v1052_v40  ;;  %v1217_v54 = vcombine.low %v860_v5, %v853_v56 }
  0xfc   :  { %v1233_v44 = vcombine.low %v861_v32, %v860_v5  ;;  %v1224_v63 = vrot.slane %v1216_v25, %v2564_v49 }
  0xfd   :  { %1294 = vmatprep.mubr.bf16.mxu0 %v1062_v2  ;;  %2007 = vmatmul.mubr.bf16.gmra.mrb[8].mxu1 %v1061_v23  ;;  %v1231_v52 = vrot.slane %v1217_v54, %v2564_v49  ;;  %v1621_v23 = vpop.permute.xlu1 %1620 }
  0xfe   :  { %1295 = vmatmul.mubr.bf16.gmra.mrb[8].mxu0 %v1060_v29  ;;  %v1240_v1 = vrot.slane %v1233_v44, %v2564_v49  ;;  %vm1641_vm7 = vcmp.eq.s32.totalorder %v1621_v23, 1 }
  0xff   :  { %v1232_v7 = vcombine.low %v1224_v63, %v1231_v52 }
 0x100   :  { %v2574_v34 = vcombine.low %v1240_v1, %v1224_v63  ;;  %v2580_v11 = vcombine.low %v1231_v52, %v1240_v1 }
 0x101   :  { %v1624_v52 = vpop.permute.xlu1 %1623 }
 0x102   :  { %vm1642_vm8 = vcmp.eq.s32.totalorder %v1624_v52, 1 }
 0x1ba   :  { %v1337_v42 = vpop.f32.mrb[0].mxu1  ;;  %v1953_v19 = vpop.f32.mrb[0].mxu0 }
 0x1bb   :  { %v2000_v51 = vpop.f32.mrb[1].mxu1  ;;  %v1954_v62 = vpop.f32.mrb[1].mxu0 }
 0x1bc   :  { %v1340_v21 = vpop.f32.mrb[2].mxu1  ;;  %v1955_v3 = vadd.f32 %v1954_v62, %v1953_v19  ;;  %v1956_v43 = vpop.f32.mrb[2].mxu0 }
 0x1bd   :  { %v2001_v60 = vpop.f32.mrb[3].mxu1  ;;  %v1957_v36 = vpop.f32.mrb[3].mxu0 }
 0x1be   :  { %v1281_v53 = vadd.f32 %v1955_v3, %v1232_v7  ;;  %v1958_v9 = vadd.f32 %v1957_v36, %v1956_v43 }
 0x1c0   :  { %v1338_v20 = vadd.f32 %v1337_v42, %v1281_v53  ;;  %v1284_v46 = vadd.f32 %v1958_v9, %v2574_v34 }
 0x1c2   :  { %v1366_v14 = vcombine.high %v1338_v20, %v1338_v20  ;;  %v1373_v4 = vrot.slane %v1338_v20, %v2564_v49  ;;  %v1341_v6 = vadd.f32 %v1340_v21, %v1284_v46 }
 0x1c4   :  { %v1380_v45 = vrot.slane %v1366_v14, %v2564_v49  ;;  %v1381_v47 = vcombine.high %v1373_v4, %v1373_v4  ;;  %v1383_v61 = vcombine.high %v1341_v6, %v1341_v6  ;;  %v1584_v8 = vmax.f32 %v1373_v4, 0.0 }
 0x1c5   :  { %v1390_v13 = vrot.slane %v1341_v6, %v2564_v49 }
 0x1c6   :  { %v1345_v15 = vpop.f32.mrb[4].mxu1  ;;  %v1585_v12 = vmax.f32 %v1381_v47, 0.0  ;;  %v1397_v18 = vrot.slane %v1383_v61, %v2564_v49  ;;  %v1586_v58 = vmax.f32 %v1380_v45, 0.0  ;;  %v1382_v24 = vcombine.high %v1380_v45, %v1380_v45 }
 0x1c7   :  { %v1959_v57 = vpop.f32.mrb[4].mxu0  ;;  %v2004_v16 = vpop.f32.mrb[5].mxu1  ;;  %v1398_v30 = vcombine.high %v1390_v13, %v1390_v13  ;;  %v1588_v31 = vmax.f32 %v1390_v13, 0.0 }
 0x1c8   :  { %v1960_v27 = vpop.f32.mrb[5].mxu0  ;;  %v1348_v28 = vpop.f32.mrb[6].mxu1  ;;  %v1672_v33 = vcombine.low %v1584_v8, %v1585_v12  ;;  %v1587_v17 = vmax.f32 %v1382_v24, 0.0  ;;  %v1686_v26 = vrot.slane %v1586_v58, %v2564_v49  ;;  %v1399_v22 = vcombine.high %v1397_v18, %v1397_v18 }
 0x1c9   :  { %v1961_v59 = vadd.f32 %v1960_v27, %v1959_v57  ;;  %v1962_v37 = vpop.f32.mrb[6].mxu0  ;;  %v2005_v35 = vpop.f32.mrb[7].mxu1  ;;  %v1589_v38 = vmax.f32 %v1398_v30, 0.0  ;;  %v1590_v32 = vmax.f32 %v1397_v18, 0.0 }
 0x1ca   :  { %v1963_v39 = vpop.f32.mrb[7].mxu0  ;;  %v1679_v40 = vrot.slane %v1672_v33, %v2564_v49  ;;  %v1688_v29 = vcombine.low %v1587_v17, %v1588_v31  ;;  %v1591_v48 = vmax.f32 %v1399_v22, 0.0 }
 0x1cb   :  { %v1289_v2 = vadd.f32 %v1961_v59, %v2580_v11  ;;  %v1964_v41 = vadd.f32 %v1963_v39, %v1962_v37  ;;  %v1702_v0 = vrot.slane %v1589_v38, %v2564_v49 }
 0x1cc   :  { %v1687_v50 = vcombine.low %v1679_v40, %v1686_v26  ;;  %v1695_v56 = vrot.slane %v1688_v29, %v2564_v49  ;;  %v1704_v19 = vcombine.low %v1590_v32, %v1591_v48  ;;  %v1630_v26 = vpop.permute.xlu1 %1629 }
 0x1cd   :  { %v1346_v55 = vadd.f32 %v1345_v15, %v1289_v2  ;;  %v1292_v5 = vadd.f32 %v1964_v41, %v1232_v7  ;;  %v2591_v7 = vpop.permute.xlu0 %1626  ;;  %vm1644_vm11 = vcmp.eq.s32.totalorder %v1630_v26, 1 }
 0x1ce   :  { %v1808_v25 = vsel %vm1640_vm6, %v1687_v50, 0.0  ;;  %v1703_v63 = vcombine.low %v1695_v56, %v1702_v0  ;;  %vm1643_vm9 = vcmp.eq.s32.totalorder %v2591_v7, 1  ;;  %v1711_v15 = vrot.slane %v1704_v19, %v2564_v49 }
 0x1cf   :  { %v1400_v54 = vcombine.high %v1346_v55, %v1346_v55  ;;  %v1407_v44 = vrot.slane %v1346_v55, %v2564_v49  ;;  %v1817_v1 = vsel %vm1816_vm0, %v1808_v25, -inf  ;;  %v1349_v42 = vadd.f32 %v1348_v28, %v1292_v5 }
 0x1d0   :  { %v1818_v51 = vrot.slane %v1817_v1, 4  ;;  %v1809_v3 = vsel %vm1641_vm7, %v1703_v63, 0.0  ;;  %v1353_v43 = vpop.f32.mrb[8].mxu1 }
 0x1d1   :  { %v1414_v62 = vrot.slane %v1400_v54, %v2564_v49  ;;  %v1415_v21 = vcombine.high %v1407_v44, %v1407_v44  ;;  %v1824_v60 = vsel %vm1816_vm0, %v1809_v3, -inf  ;;  %v1417_v36 = vcombine.high %v1349_v42, %v1349_v42  ;;  %v1965_v20 = vpop.f32.mrb[8].mxu0  ;;  %v2008_v46 = vpop.f32.mrb[9].mxu1 }
 0x1d2   :  { %v1424_v53 = vrot.slane %v1349_v42, %v2564_v49  ;;  %v1592_v9 = vmax.f32 %v1407_v44, 0.0  ;;  %v1819_v14 = vmax.f32 %v1817_v1, %v1818_v51  ;;  %v1825_v6 = vrot.slane %v1824_v60, 4  ;;  %v1966_v45 = vpop.f32.mrb[9].mxu0  ;;  %v1356_v47 = vpop.f32.mrb[10].mxu1 }
 0x1d3   :  { %v1593_v4 = vmax.f32 %v1415_v21, 0.0  ;;  %v1416_v61 = vcombine.high %v1414_v62, %v1414_v62  ;;  %v1431_v8 = vrot.slane %v1417_v36, %v2564_v49  ;;  %v1968_v12 = vpop.f32.mrb[10].mxu0  ;;  %v2009_v18 = vpop.f32.mrb[11].mxu1  ;;  %v1967_v58 = vadd.f32 %v1966_v45, %v1965_v20 }
 0x1d4   :  { %v1432_v13 = vcombine.high %v1424_v53, %v1424_v53  ;;  %v1718_v10 = vrot.slane %v1592_v9, %v2564_v49  ;;  %v1820_v57 = vrot.slane %v1819_v14, 2  ;;  %v1826_v16 = vmax.f32 %v1824_v60, %v1825_v6  ;;  %v1969_v27 = vpop.f32.mrb[11].mxu0 }
 0x1d5   :  { %v1594_v24 = vmax.f32 %v1414_v62, 0.0  ;;  %v1595_v31 = vmax.f32 %v1416_v61, 0.0  ;;  %v1970_v33 = vadd.f32 %v1969_v27, %v1968_v12  ;;  %v1297_v37 = vadd.f32 %v1967_v58, %v2574_v34 }
 0x1d6   :  { %v1597_v28 = vmax.f32 %v1432_v13, 0.0  ;;  %v1719_v30 = vcombine.low %v1711_v15, %v1718_v10  ;;  %v1821_v59 = vmax.f32 %v1819_v14, %v1820_v57  ;;  %v1827_v17 = vrot.slane %v1826_v16, 2 }
 0x1d7   :  { %v1720_v35 = vcombine.low %v1593_v4, %v1594_v24  ;;  %v1596_v38 = vmax.f32 %v1424_v53, 0.0  ;;  %v1734_v22 = vrot.slane %v1595_v31, %v2564_v49  ;;  %v1300_v40 = vadd.f32 %v1970_v33, %v2580_v11  ;;  %v1633_v24 = vpop.permute.xlu0 %1632 }
 0x1d8   :  { %v1810_v39 = vsel %vm1642_vm8, %v1719_v30, 0.0  ;;  %v1822_v2 = vrot.slane %v1821_v59, 1  ;;  %v1828_v23 = vmax.f32 %v1826_v16, %v1827_v17  ;;  %v1354_v41 = vadd.f32 %v1353_v43, %v1297_v37 }
 0x1d9   :  { %v1831_v29 = vsel %vm1816_vm0, %v1810_v39, -inf  ;;  %v1727_v48 = vrot.slane %v1720_v35, %v2564_v49  ;;  %v1357_v50 = vadd.f32 %v1356_v47, %v1300_v40  ;;  %v1736_v34 = vcombine.low %v1596_v38, %v1597_v28  ;;  %v1636_v38 = vpop.permute.xlu1 %1635 }
 0x1da   :  { %v1832_v0 = vrot.slane %v1831_v29, 4  ;;  %v1829_v55 = vrot.slane %v1828_v23, 1  ;;  %v1434_v56 = vcombine.high %v1354_v41, %v1354_v41  ;;  %v1441_v5 = vrot.slane %v1354_v41, %v2564_v49 }
 0x1db   :  { %v1598_v32 = vmax.f32 %v1431_v8, 0.0  ;;  %v1823_v25 = vmax.f32 %v1821_v59, %v1822_v2  ;;  %v1735_v11 = vcombine.low %v1727_v48, %v1734_v22  ;;  %v1451_v44 = vcombine.high %v1357_v50, %v1357_v50 }
 0x1dc   :  { %v1833_v54 = vmax.f32 %v1831_v29, %v1832_v0  ;;  %v1830_v63 = vmax.f32 %v1828_v23, %v1829_v55  ;;  %v1448_v52 = vrot.slane %v1434_v56, %v2564_v49  ;;  %v1458_v1 = vrot.slane %v1357_v50, %v2564_v49  ;;  %v1639_v55 = vpop.permute.xlu0 %1638 }
 0x1dd   :  { %v1743_v42 = vrot.slane %v1736_v34, %v2564_v49  ;;  %v1600_v51 = vmax.f32 %v1441_v5, 0.0  ;;  %v1811_v62 = vsel %vm1643_vm9, %v1735_v11, 0.0  ;;  %v1465_v21 = vrot.slane %v1451_v44, %v2564_v49 }
 0x1de   :  { %v1834_v19 = vrot.slane %v1833_v54, 2  ;;  %v1882_v3 = vsel %vm1881_vm10, %v1830_v63, %v1823_v25  ;;  %v1838_v43 = vsel %vm1816_vm0, %v1811_v62, -inf  ;;  %v1750_v60 = vrot.slane %v1598_v32, %v2564_v49 }
 0x1df   :  { %v1433_v36 = vcombine.high %v1431_v8, %v1431_v8  ;;  %v1839_v9 = vrot.slane %v1838_v43, 4  ;;  %v1449_v20 = vcombine.high %v1441_v5, %v1441_v5  ;;  %v1450_v46 = vcombine.high %v1448_v52, %v1448_v52 }
 0x1e0   :  { %v1835_v53 = vmax.f32 %v1833_v54, %v1834_v19  ;;  %v1466_v14 = vcombine.high %v1458_v1, %v1458_v1  ;;  %v1751_v4 = vcombine.low %v1743_v42, %v1750_v60  ;;  %v1602_v45 = vmax.f32 %v1448_v52, 0.0 }
 0x1e1   :  { %v1599_v6 = vmax.f32 %v1433_v36, 0.0  ;;  %v1840_v7 = vmax.f32 %v1838_v43, %v1839_v9  ;;  %v1601_v61 = vmax.f32 %v1449_v20, 0.0  ;;  %v1603_v13 = vmax.f32 %v1450_v46, 0.0 }
 0x1e2   :  { %v1836_v47 = vrot.slane %v1835_v53, 1  ;;  %v1812_v15 = vsel %vm1644_vm11, %v1751_v4, 0.0  ;;  %v1604_v12 = vmax.f32 %v1458_v1, 0.0  ;;  %v1467_v18 = vcombine.high %v1465_v21, %v1465_v21 }
 0x1e3   :  { %v1752_v10 = vcombine.low %v1599_v6, %v1600_v51  ;;  %v1841_v16 = vrot.slane %v1840_v7, 2  ;;  %v1845_v8 = vsel %vm1816_vm0, %v1812_v15, -inf  ;;  %v1766_v58 = vrot.slane %v1601_v61, %v2564_v49 }
 0x1e4   :  { %v1837_v57 = vmax.f32 %v1835_v53, %v1836_v47  ;;  %v1846_v27 = vrot.slane %v1845_v8, 4  ;;  %v1768_v30 = vcombine.low %v1602_v45, %v1603_v13  ;;  %v1605_v31 = vmax.f32 %v1466_v14, 0.0 }
 0x1e5   :  { %v1759_v28 = vrot.slane %v1752_v10, %v2564_v49  ;;  %v1842_v59 = vmax.f32 %v1840_v7, %v1841_v16  ;;  %v1606_v17 = vmax.f32 %v1465_v21, 0.0  ;;  %v1607_v37 = vmax.f32 %v1467_v18, 0.0 }
 0x1e6   :  { %v1884_v33 = vsel %vm1883_vm12, %v1837_v57, %v1882_v3  ;;  %v1847_v35 = vmax.f32 %v1845_v8, %v1846_v27  ;;  %v1775_v39 = vrot.slane %v1768_v30, %v2564_v49  ;;  %v1782_v22 = vrot.slane %v1604_v12, %v2564_v49 }
 0x1e7   :  { %v1767_v26 = vcombine.low %v1759_v28, %v1766_v58  ;;  %v1843_v40 = vrot.slane %v1842_v59, 1  ;;  %vm1645_vm13 = vcmp.eq.s32.totalorder %v1633_v24, 1  ;;  %v1784_v2 = vcombine.low %v1605_v31, %v1606_v17 }
 0x1e8   :  { %v1798_v23 = vrot.slane %v1607_v37, %v2564_v49  ;;  %v1848_v29 = vrot.slane %v1847_v35, 2  ;;  %v1783_v0 = vcombine.low %v1775_v39, %v1782_v22  ;;  %vm1646_vm15 = vcmp.eq.s32.totalorder %v1636_v38, 1 }
 0x1e9   :  { %v1813_v41 = vsel %vm1645_vm13, %v1767_v26, 0.0  ;;  %v1844_v48 = vmax.f32 %v1842_v59, %v1843_v40  ;;  %v1791_v34 = vrot.slane %v1784_v2, %v2564_v49  ;;  %vm1647_vm1 = vcmp.eq.s32.totalorder %v1639_v55, 1 }
 0x1ea   :  { %v1852_v50 = vsel %vm1816_vm0, %v1813_v41, -inf  ;;  %v1849_v56 = vmax.f32 %v1847_v35, %v1848_v29  ;;  %v1814_v32 = vsel %vm1646_vm15, %v1783_v0, 0.0 }
 0x1eb   :  { %v1853_v5 = vrot.slane %v1852_v50, 4  ;;  %v1859_v25 = vsel %vm1816_vm0, %v1814_v32, -inf  ;;  %v1799_v54 = vcombine.low %v1791_v34, %v1798_v23  ;;  %v1886_v11 = vsel %vm1885_vm14, %v1844_v48, %v1884_v33 }
 0x1ec   :  { %v1850_v44 = vrot.slane %v1849_v56, 1  ;;  %v1860_v52 = vrot.slane %v1859_v25, 4 }
 0x1ed   :  { %v1854_v63 = vmax.f32 %v1852_v50, %v1853_v5  ;;  %v1815_v1 = vsel %vm1647_vm1, %v1799_v54, 0.0 }
 0x1ee   :  { %v1851_v42 = vmax.f32 %v1849_v56, %v1850_v44  ;;  %v1861_v51 = vmax.f32 %v1859_v25, %v1860_v52  ;;  %v1866_v62 = vsel %vm1816_vm0, %v1815_v1, -inf }
 0x1ef   :  { %v1855_v19 = vrot.slane %v1854_v63, 2  ;;  %v1867_v49 = vrot.slane %v1866_v62, 4 }
 0x1f0   :  { %v1862_v3 = vrot.slane %v1861_v51, 2  ;;  %v1888_v43 = vsel %vm1887_vm2, %v1851_v42, %v1886_v11 }
 0x1f1   :  { %v1856_v21 = vmax.f32 %v1854_v63, %v1855_v19  ;;  %v1868_v60 = vmax.f32 %v1866_v62, %v1867_v49 }
 0x1f2   :  { %v1863_v53 = vmax.f32 %v1861_v51, %v1862_v3 }
 0x1f3   :  { %v1857_v36 = vrot.slane %v1856_v21, 1  ;;  %v1869_v9 = vrot.slane %v1868_v60, 2 }
 0x1f4   :  { %v1864_v46 = vrot.slane %v1863_v53, 1 }
 0x1f5   :  { %v1858_v20 = vmax.f32 %v1856_v21, %v1857_v36  ;;  %v1870_v14 = vmax.f32 %v1868_v60, %v1869_v9 }
 0x1f6   :  { %v1865_v4 = vmax.f32 %v1863_v53, %v1864_v46 }
 0x1f7   :  { %v1890_v6 = vsel %vm1889_vm3, %v1858_v20, %v1888_v43  ;;  %v1871_v45 = vrot.slane %v1870_v14, 1 }
 0x1f8   :  { %v1892_v47 = vsel %vm1891_vm4, %v1865_v4, %v1890_v6 }
 0x1f9   :  { %v1872_v7 = vmax.f32 %v1870_v14, %v1871_v45 }
 0x1fb   :  { %v1894_v61 = vsel %vm1893_vm5, %v1872_v7, %v1892_v47 }
 0x1fc   :  { %1896 = vst [vmem:[#allocation5] sm:$0xff] %v1894_v61 }
 0x1fd   :  { %2079 = shalt.err (!%p2076_p12)
}
 0x1fe   :  { %s2080_s10 = scalar_lea.hbm %s2643_s4, 128 }
 0x1ff   :  { %p2081_p13 = scmp.ne.s32.totalorder %s2643_s4, %s2080_s10  ;;  %p2084_p0 = scmp.lt.u32.totalorder %s2080_s10, %s2643_s4 }
 0x201   :  { %p2086_p1 = pnand %p2084_p0, %p2081_p13 }
 0x203   :  { %2089 = shalt.err (!%p2086_p1)
}
 0x204   :  { %1906 = dma.vmem_to_hbm [thread:$0]  %s1904_s6, 128, %s2643_s4, [#allocation4]  }
 0x205   :  { %2092 = dma.done.wait [#allocation4], 128  }
 0x206   :  { %2093 = vsyncadd [#allocation4], 4294967168 }
 0x207   :  { %1910 = vsyncpa [#allocation3], 1 }
 0x208   :  { %1911 = vsyncpa [#allocation4], 1 }

</bundles_post_ra>
